<compile_context>
chip_gen: v7x
topology: tpu7x:2x2x1
jax: 0.10.0
libtpu: 0.0.40
codegen_flags: <defaults>
</compile_context>

<pallas_src>
import math
import functools
import numpy as np
import jax
import jax.numpy as jnp
from jax.experimental import pallas as pl
from jax.experimental.pallas import tpu as pltpu


# --------------------------------------------------------------------------------------
# Kernel: one grid step == one full decoder layer on the whole (B*T, D) activation block.
# --------------------------------------------------------------------------------------
def _decoder_stack_kernel(x_ref, ctx_ref,
                          w_sa_qkv_ref, b_sa_qkv_ref, w_sa_o_ref, b_sa_o_ref,
                          w_ca_q_ref, b_ca_q_ref, w_ca_kv_ref, b_ca_kv_ref,
                          w_ca_o_ref, b_ca_o_ref,
                          ln_ref, w1_ref, b1_ref, w2_ref, b2_ref,
                          o_ref,
                          resid_ref, kvctx_ref,
                          *, B, T, S, n_heads, eps1, eps2, eps3):
    layer = pl.program_id(0)
    D = x_ref.shape[-1]
    Dh = D // n_heads
    cdt = x_ref.dtype                      # matmul compute dtype (f32 or bf16)

    @pl.when(layer == 0)
    def _init():
        # Residual stream carried across the layer grid axis, accumulated in f32.
        resid_ref[...] = x_ref[...].astype(jnp.float32)
        # Hoist cross-attention K/V of the context: weights are identical in every layer
        # and ctx never changes, so K_ctx/V_ctx are computed exactly once.
        kvctx_ref[...] = (
            jnp.dot(ctx_ref[...], w_ca_kv_ref[...], preferred_element_type=jnp.float32)
            + b_ca_kv_ref[...].astype(jnp.float32)
        ).astype(kvctx_ref.dtype)

    ln = ln_ref[...]                        # (6, D) f32: g1,b1,g2,b2,g3,b3

    def layer_norm(v32, g, b, eps):
        mu = jnp.mean(v32, axis=-1, keepdims=True)
        var = jnp.mean(jnp.square(v32 - mu), axis=-1, keepdims=True)
        return (v32 - mu) * jax.lax.rsqrt(var + eps) * g[None, :] + b[None, :]

    def mh_attend(q2d, k2d, v2d, q_rows, kv_rows):
        # q2d: (B*q_rows, D); k2d/v2d: (B*kv_rows, D)  ->  (B*q_rows, D) f32.
        # Heads are batched into a single 3-D einsum (no per-head matmul loop); the
        # 1/sqrt(Dh) scale is already folded into the Q projection weights.
        outs = []
        for b in range(B):                                  # static, small batch
            rq = slice(b * q_rows, (b + 1) * q_rows)
            rk = slice(b * kv_rows, (b + 1) * kv_rows)
            qh = jnp.stack([q2d[rq, h * Dh:(h + 1) * Dh] for h in range(n_heads)], axis=0)
            kh = jnp.stack([k2d[rk, h * Dh:(h + 1) * Dh] for h in range(n_heads)], axis=0)
            vh = jnp.stack([v2d[rk, h * Dh:(h + 1) * Dh] for h in range(n_heads)], axis=0)
            s = jnp.einsum("hqd,hkd->hqk", qh, kh,
                           preferred_element_type=jnp.float32)       # (H, q, kv)
            s = s - jnp.max(s, axis=-1, keepdims=True)                # stable softmax
            p = jnp.exp(s)
            # exact reciprocal keeps f32 parity with the reference; flip approx=True
            # for the free EUP path when running bf16.
            p = p * pl.reciprocal(jnp.sum(p, axis=-1, keepdims=True), approx=False)
            o = jnp.einsum("hqk,hkd->hqd", p.astype(cdt), vh,
                           preferred_element_type=jnp.float32)        # (H, q, Dh)
            outs.append(jnp.concatenate([o[h] for h in range(n_heads)], axis=-1))
        return jnp.concatenate(outs, axis=0)                          # (B*q_rows, D) f32

    h32 = resid_ref[...]                       # (B*T, D) f32 residual stream
    h = h32.astype(cdt)

    # ---- self-attention (fused QKV projection) + residual + norm1 ----
    qkv = (jnp.dot(h, w_sa_qkv_ref[...], preferred_element_type=jnp.float32)
           + b_sa_qkv_ref[...].astype(jnp.float32)).astype(cdt)       # (B*T, 3D)
    attn = mh_attend(qkv[:, :D], qkv[:, D:2 * D], qkv[:, 2 * D:], T, T)
    sa = (jnp.dot(attn.astype(cdt), w_sa_o_ref[...], preferred_element_type=jnp.float32)
          + b_sa_o_ref[...].astype(jnp.float32))
    h32 = layer_norm(h32 + sa, ln[0], ln[1], eps1)

    # ---- cross-attention (K/V of ctx precomputed once) + residual + norm2 ----
    qc = (jnp.dot(h32.astype(cdt), w_ca_q_ref[...], preferred_element_type=jnp.float32)
          + b_ca_q_ref[...].astype(jnp.float32)).astype(cdt)          # (B*T, D)
    kvc = kvctx_ref[...]                                               # (B*S, 2D)
    attn_c = mh_attend(qc, kvc[:, :D], kvc[:, D:], T, S)
    ca = (jnp.dot(attn_c.astype(cdt), w_ca_o_ref[...], preferred_element_type=jnp.float32)
          + b_ca_o_ref[...].astype(jnp.float32))
    h32 = layer_norm(h32 + ca, ln[2], ln[3], eps2)

    # ---- feed-forward + residual + norm3 ----
    hid = jnp.maximum(
        jnp.dot(h32.astype(cdt), w1_ref[...], preferred_element_type=jnp.float32)
        + b1_ref[...].astype(jnp.float32), 0.0)                        # (B*T, F)
    ff = (jnp.dot(hid.astype(cdt), w2_ref[...], preferred_element_type=jnp.float32)
          + b2_ref[...].astype(jnp.float32))
    h32 = layer_norm(h32 + ff, ln[4], ln[5], eps3)

    resid_ref[...] = h32
    # Output block index is constant across the layer axis -> resident in VMEM; only the
    # final value is flushed to HBM.
    o_ref[...] = h32.astype(o_ref.dtype)


# --------------------------------------------------------------------------------------
# Host-side weight packing (fused QKV / cross-KV, softmax scale folded into Q).
# --------------------------------------------------------------------------------------
def _pack_params(p, n_heads, dtype):
    D = p["wsa"].shape[-1]
    Dh = D // n_heads
    scale = 1.0 / math.sqrt(Dh)
    wsa, bsa = p["wsa"], p["bsa"]
    wca, bca = p["wca"], p["bca"]
    packed = {
        "w_sa_qkv": jnp.concatenate([wsa[0] * scale, wsa[1], wsa[2]], axis=1),   # (D, 3D)
        "b_sa_qkv": jnp.concatenate([bsa[0] * scale, bsa[1], bsa[2]])[None, :],  # (1, 3D)
        "w_sa_o": wsa[3], "b_sa_o": bsa[3][None, :],
        "w_ca_q": wca[0] * scale, "b_ca_q": (bca[0] * scale)[None, :],
        "w_ca_kv": jnp.concatenate([wca[1], wca[2]], axis=1),                    # (D, 2D)
        "b_ca_kv": jnp.concatenate([bca[1], bca[2]])[None, :],                   # (1, 2D)
        "w_ca_o": wca[3], "b_ca_o": bca[3][None, :],
        "w1": p["w1"], "b1": p["b1"], "w2": p["w2"], "b2": p["b2"],
    }
    out = {k: v.astype(dtype) for k, v in packed.items()}
    out["ln"] = p["ln"].astype(jnp.float32)   # LayerNorm params stay f32 (VPU math in f32)
    return out


# --------------------------------------------------------------------------------------
# Wrapper: ONE pallas_call for the whole decoder stack (layer axis is the grid).
# --------------------------------------------------------------------------------------
def transformer_decoder(x, ctx, layer_params, *, num_layers, n_heads):
    # nn.ModuleList([copy.deepcopy(layer) ...]) => all layers share identical weights,
    # so a single parameter set is reused for every grid step.
    B, T, D = x.shape
    S = ctx.shape[1]
    F = layer_params["w1"].shape[1]
    assert D % n_heads == 0

    p = _pack_params(layer_params, n_heads, x.dtype)
    # Fold batch into the token dimension for all token-parallel matmuls.
    x2d = x.reshape(B * T, D)
    ctx2d = ctx.reshape(B * S, D)

    kernel = functools.partial(
        _decoder_stack_kernel, B=B, T=T, S=S, n_heads=n_heads,
        # norm1/norm3 use the module's eps=1e-6; norm2 is nn.LayerNorm default 1e-5.
        eps1=1e-6, eps2=1e-5, eps3=1e-6)

    def const_spec(shape):
        n = len(shape)
        return pl.BlockSpec(shape, lambda l, _n=n: (0,) * _n)

    args = [x2d, ctx2d,
            p["w_sa_qkv"], p["b_sa_qkv"], p["w_sa_o"], p["b_sa_o"],
            p["w_ca_q"], p["b_ca_q"], p["w_ca_kv"], p["b_ca_kv"],
            p["w_ca_o"], p["b_ca_o"],
            p["ln"], p["w1"], p["b1"], p["w2"], p["b2"]]
    in_specs = [const_spec(a.shape) for a in args]

    # ---- VMEM budget + cost estimate ----
    bpe = jnp.dtype(x.dtype).itemsize
    w_bytes = int(sum(v.size * jnp.dtype(v.dtype).itemsize for v in p.values()))
    act_bytes = int((x2d.size + ctx2d.size + B * T * D) * bpe)
    scratch_bytes = int(B * T * D * 4 + B * S * 2 * D * bpe)
    transient_bytes = int(4 * (B * T * 3 * D + 2 * B * n_heads * T * max(T, S) + B * T * F))
    vmem_need = 2 * (w_bytes + act_bytes) + scratch_bytes + transient_bytes
    # raise the scoped default (16 MiB on v5e / 32 MiB elsewhere); keep headroom vs v7x 64 MiB
    vmem_limit = int(min(96 * 2**20, max(32 * 2**20, vmem_need)))

    flops_proj = 2 * B * T * (3 * D * D) + 3 * (2 * B * T * D * D)
    flops_attn = 4 * B * T * T * D + 4 * B * T * S * D
    flops_ffn = 4 * B * T * D * F
    flops = num_layers * (flops_proj + flops_attn + flops_ffn) + 4 * B * S * D * D
    transcendentals = num_layers * (B * n_heads * (T * T + T * S) + 3 * B * T)
    cost = pl.CostEstimate(flops=int(flops), transcendentals=int(transcendentals),
                           bytes_accessed=int(w_bytes + act_bytes))

    out2d = pl.pallas_call(
        kernel,
        out_shape=jax.ShapeDtypeStruct((B * T, D), x.dtype),
        grid=(num_layers,),
        in_specs=in_specs,
        out_specs=const_spec((B * T, D)),
        scratch_shapes=[
            pltpu.VMEM((B * T, D), jnp.float32),      # residual stream (persists over layers)
            pltpu.VMEM((B * S, 2 * D), x.dtype),      # hoisted cross-attn K/V of ctx
        ],
        compiler_params=pltpu.CompilerParams(
            dimension_semantics=("arbitrary",),       # layers are sequential
            vmem_limit_bytes=vmem_limit),
        cost_estimate=cost,
    )(*args)
    # TODO(synk): for large B*T / S / F the activation & FFN blocks should additionally be
    # tiled over rows (extra "parallel" grid axes); whole-block residency is used here.
    return out2d.reshape(B, T, D)


# ---------------- pure-JAX reference (for correctness check) ----------------
def _ref_layer(x, ctx, p, n_heads):
    D = x.shape[-1]
    Dh = D // n_heads

    def ln_fn(v, g, b, eps):
        mu = jnp.mean(v, axis=-1, keepdims=True)
        var = jnp.mean(jnp.square(v - mu), axis=-1, keepdims=True)
        return (v - mu) / jnp.sqrt(var + eps) * g + b

    def mha(q_in, kv_in, W, B):
        q = q_in @ W[0] + B[0]
        k = kv_in @ W[1] + B[1]
        v = kv_in @ W[2] + B[2]
        outs = []
        for h in range(n_heads):
            sl = slice(h * Dh, (h + 1) * Dh)
            s = (q[..., sl] @ jnp.swapaxes(k[..., sl], -1, -2)) / math.sqrt(Dh)
            pattn = jax.nn.softmax(s, axis=-1)
            outs.append(pattn @ v[..., sl])
        return jnp.concatenate(outs, axis=-1) @ W[3] + B[3]

    out = x + mha(x, x, p["wsa"], p["bsa"])
    out = ln_fn(out, p["ln"][0], p["ln"][1], 1e-6)
    out = out + mha(out, ctx, p["wca"], p["bca"])
    out = ln_fn(out, p["ln"][2], p["ln"][3], 1e-5)
    hid = jax.nn.relu(out @ p["w1"] + p["b1"][0])
    out = out + (hid @ p["w2"] + p["b2"][0])
    out = ln_fn(out, p["ln"][4], p["ln"][5], 1e-6)
    return out


def init_layer_params(key, d_model, dim_ff):
    ks = jax.random.split(key, 8)
    s = 0.05
    return {
        "wsa": s * jax.random.normal(ks[0], (4, d_model, d_model), jnp.float32),
        "bsa": s * jax.random.normal(ks[1], (4, d_model), jnp.float32),
        "wca": s * jax.random.normal(ks[2], (4, d_model, d_model), jnp.float32),
        "bca": s * jax.random.normal(ks[3], (4, d_model), jnp.float32),
        # LayerNorm init: gamma=1, beta=0 (as in nn.LayerNorm)
        "ln": jnp.stack([jnp.ones(d_model), jnp.zeros(d_model),
                         jnp.ones(d_model), jnp.zeros(d_model),
                         jnp.ones(d_model), jnp.zeros(d_model)]).astype(jnp.float32),
        "w1": s * jax.random.normal(ks[4], (d_model, dim_ff), jnp.float32),
        "b1": s * jax.random.normal(ks[5], (1, dim_ff), jnp.float32),
        "w2": s * jax.random.normal(ks[6], (dim_ff, d_model), jnp.float32),
        "b2": s * jax.random.normal(ks[7], (1, d_model), jnp.float32),
    }


if __name__ == "__main__":
    B, T, S, D, H, F, L = 2, 8, 8, 32, 4, 64, 2
    key = jax.random.PRNGKey(0)
    kx, kc, kp = jax.random.split(key, 3)
    x = jax.random.normal(kx, (B, T, D), jnp.float32)
    ctx = jax.random.normal(kc, (B, S, D), jnp.float32)
    params = init_layer_params(kp, D, F)

    out = transformer_decoder(x, ctx, params, num_layers=L, n_heads=H)
    out = jax.block_until_ready(out)

    # reference check
    ref = x
    for _ in range(L):
        ref = _ref_layer(ref, ctx, params, H)
    np.testing.assert_allclose(np.asarray(out), np.asarray(ref), rtol=5e-4, atol=5e-4)

    print("KERNEL_OK")
</pallas_src>

<mosaic_0001>
module attributes {stable_mosaic.version = 11 : i64} {
  func.func @_decoder_stack_kernel(%arg0: i32, %arg1: memref<16x32xf32, #tpu.memory_space<vmem>>, %arg2: memref<16x32xf32, #tpu.memory_space<vmem>>, %arg3: memref<32x96xf32, #tpu.memory_space<vmem>>, %arg4: memref<1x96xf32, #tpu.memory_space<vmem>>, %arg5: memref<32x32xf32, #tpu.memory_space<vmem>>, %arg6: memref<1x32xf32, #tpu.memory_space<vmem>>, %arg7: memref<32x32xf32, #tpu.memory_space<vmem>>, %arg8: memref<1x32xf32, #tpu.memory_space<vmem>>, %arg9: memref<32x64xf32, #tpu.memory_space<vmem>>, %arg10: memref<1x64xf32, #tpu.memory_space<vmem>>, %arg11: memref<32x32xf32, #tpu.memory_space<vmem>>, %arg12: memref<1x32xf32, #tpu.memory_space<vmem>>, %arg13: memref<6x32xf32, #tpu.memory_space<vmem>>, %arg14: memref<32x64xf32, #tpu.memory_space<vmem>>, %arg15: memref<1x64xf32, #tpu.memory_space<vmem>>, %arg16: memref<64x32xf32, #tpu.memory_space<vmem>>, %arg17: memref<1x32xf32, #tpu.memory_space<vmem>>, %arg18: memref<16x32xf32, #tpu.memory_space<vmem>>, %arg19: memref<16x32xf32, #tpu.memory_space<vmem>>, %arg20: memref<16x64xf32, #tpu.memory_space<vmem>>) attributes {dimension_semantics = [#tpu.dimension_semantics<arbitrary>], iteration_bounds = array<i64: 2>, scalar_prefetch = 0 : i64, scratch_operands = 2 : i64, tpu.core_type = #tpu.core_type<tc>, window_params = [{pipeline_mode = #tpu.pipeline_mode<synchronous>, transform_indices = @transform_0, window_bounds = array<i64: 16, 32>}, {pipeline_mode = #tpu.pipeline_mode<synchronous>, transform_indices = @transform_1, window_bounds = array<i64: 16, 32>}, {pipeline_mode = #tpu.pipeline_mode<synchronous>, transform_indices = @transform_2, window_bounds = array<i64: 32, 96>}, {pipeline_mode = #tpu.pipeline_mode<synchronous>, transform_indices = @transform_3, window_bounds = array<i64: 1, 96>}, {pipeline_mode = #tpu.pipeline_mode<synchronous>, transform_indices = @transform_4, window_bounds = array<i64: 32, 32>}, {pipeline_mode = #tpu.pipeline_mode<synchronous>, transform_indices = @transform_5, window_bounds = array<i64: 1, 32>}, {pipeline_mode = #tpu.pipeline_mode<synchronous>, transform_indices = @transform_6, window_bounds = array<i64: 32, 32>}, {pipeline_mode = #tpu.pipeline_mode<synchronous>, transform_indices = @transform_7, window_bounds = array<i64: 1, 32>}, {pipeline_mode = #tpu.pipeline_mode<synchronous>, transform_indices = @transform_8, window_bounds = array<i64: 32, 64>}, {pipeline_mode = #tpu.pipeline_mode<synchronous>, transform_indices = @transform_9, window_bounds = array<i64: 1, 64>}, {pipeline_mode = #tpu.pipeline_mode<synchronous>, transform_indices = @transform_10, window_bounds = array<i64: 32, 32>}, {pipeline_mode = #tpu.pipeline_mode<synchronous>, transform_indices = @transform_11, window_bounds = array<i64: 1, 32>}, {pipeline_mode = #tpu.pipeline_mode<synchronous>, transform_indices = @transform_12, window_bounds = array<i64: 6, 32>}, {pipeline_mode = #tpu.pipeline_mode<synchronous>, transform_indices = @transform_13, window_bounds = array<i64: 32, 64>}, {pipeline_mode = #tpu.pipeline_mode<synchronous>, transform_indices = @transform_14, window_bounds = array<i64: 1, 64>}, {pipeline_mode = #tpu.pipeline_mode<synchronous>, transform_indices = @transform_15, window_bounds = array<i64: 64, 32>}, {pipeline_mode = #tpu.pipeline_mode<synchronous>, transform_indices = @transform_16, window_bounds = array<i64: 1, 32>}, {pipeline_mode = #tpu.pipeline_mode<synchronous>, transform_indices = @transform_17, window_bounds = array<i64: 16, 32>}]} {
    %c0_i32 = arith.constant 0 : i32
    %0 = arith.cmpi eq, %arg0, %c0_i32 : i32
    %1 = arith.extui %0 : i1 to i32
    %c0_i32_0 = arith.constant 0 : i32
    %2 = arith.cmpi ne, %1, %c0_i32_0 : i32
    scf.if %2 {
      %c0_71 = arith.constant 0 : index
      %c0_72 = arith.constant 0 : index
      %326 = vector.load %arg1[%c0_71, %c0_72] : memref<16x32xf32, #tpu.memory_space<vmem>>, vector<16x32xf32>
      %c0_73 = arith.constant 0 : index
      %c0_74 = arith.constant 0 : index
      %327 = vector.load %arg19[%c0_73, %c0_74] : memref<16x32xf32, #tpu.memory_space<vmem>>, vector<16x32xf32>
      tpu.vector_store %arg19[%c0_73, %c0_74], %326 {strides = array<i32>} : memref<16x32xf32, #tpu.memory_space<vmem>>, vector<16x32xf32>,
      %c0_75 = arith.constant 0 : index
      %c0_76 = arith.constant 0 : index
      %328 = vector.load %arg2[%c0_75, %c0_76] : memref<16x32xf32, #tpu.memory_space<vmem>>, vector<16x32xf32>
      %c0_77 = arith.constant 0 : index
      %c0_78 = arith.constant 0 : index
      %329 = vector.load %arg9[%c0_77, %c0_78] : memref<32x64xf32, #tpu.memory_space<vmem>>, vector<32x64xf32>
      %cst_79 = arith.constant dense<0.000000e+00> : vector<16x64xf32>
      %330 = tpu.matmul %328, %329, %cst_79 {dimension_numbers = #tpu.dot_dimension_numbers<[1], [0], [0], [1], [0, 0, 1, 1], [], []>} : vector<16x32xf32>, vector<32x64xf32>, vector<16x64xf32> -> vector<16x64xf32>
      %c0_80 = arith.constant 0 : index
      %c0_81 = arith.constant 0 : index
      %331 = vector.load %arg10[%c0_80, %c0_81] : memref<1x64xf32, #tpu.memory_space<vmem>>, vector<1x64xf32>
      %332 = vector.broadcast %331 : vector<1x64xf32> to vector<16x64xf32>
      %333 = arith.addf %330, %332 : vector<16x64xf32>
      %c0_82 = arith.constant 0 : index
      %c0_83 = arith.constant 0 : index
      %334 = vector.load %arg20[%c0_82, %c0_83] : memref<16x64xf32, #tpu.memory_space<vmem>>, vector<16x64xf32>
      tpu.vector_store %arg20[%c0_82, %c0_83], %333 {strides = array<i32>} : memref<16x64xf32, #tpu.memory_space<vmem>>, vector<16x64xf32>,
    } else {
    }
    %c0 = arith.constant 0 : index
    %c0_1 = arith.constant 0 : index
    %3 = vector.load %arg13[%c0, %c0_1] : memref<6x32xf32, #tpu.memory_space<vmem>>, vector<6x32xf32>
    %c0_2 = arith.constant 0 : index
    %c0_3 = arith.constant 0 : index
    %4 = vector.load %arg19[%c0_2, %c0_3] : memref<16x32xf32, #tpu.memory_space<vmem>>, vector<16x32xf32>
    %c0_4 = arith.constant 0 : index
    %c0_5 = arith.constant 0 : index
    %5 = vector.load %arg3[%c0_4, %c0_5] : memref<32x96xf32, #tpu.memory_space<vmem>>, vector<32x96xf32>
    %cst = arith.constant dense<0.000000e+00> : vector<16x96xf32>
    %6 = tpu.matmul %4, %5, %cst {dimension_numbers = #tpu.dot_dimension_numbers<[1], [0], [0], [1], [0, 0, 1, 1], [], []>} : vector<16x32xf32>, vector<32x96xf32>, vector<16x96xf32> -> vector<16x96xf32>
    %c0_6 = arith.constant 0 : index
    %c0_7 = arith.constant 0 : index
    %7 = vector.load %arg4[%c0_6, %c0_7] : memref<1x96xf32, #tpu.memory_space<vmem>>, vector<1x96xf32>
    %8 = vector.broadcast %7 : vector<1x96xf32> to vector<16x96xf32>
    %9 = arith.addf %6, %8 : vector<16x96xf32>
    %10 = vector.extract_strided_slice %9 {offsets = [0, 0], sizes = [16, 32], strides = [1, 1]} : vector<16x96xf32> to vector<16x32xf32>
    %11 = vector.extract_strided_slice %9 {offsets = [0, 32], sizes = [16, 32], strides = [1, 1]} : vector<16x96xf32> to vector<16x32xf32>
    %12 = vector.extract_strided_slice %9 {offsets = [0, 64], sizes = [16, 32], strides = [1, 1]} : vector<16x96xf32> to vector<16x32xf32>
    %13 = vector.extract_strided_slice %10 {offsets = [0, 0], sizes = [8, 8], strides = [1, 1]} : vector<16x32xf32> to vector<8x8xf32>
    %14 = vector.extract_strided_slice %10 {offsets = [0, 8], sizes = [8, 8], strides = [1, 1]} : vector<16x32xf32> to vector<8x8xf32>
    %15 = vector.extract_strided_slice %10 {offsets = [0, 16], sizes = [8, 8], strides = [1, 1]} : vector<16x32xf32> to vector<8x8xf32>
    %16 = vector.extract_strided_slice %10 {offsets = [0, 24], sizes = [8, 8], strides = [1, 1]} : vector<16x32xf32> to vector<8x8xf32>
    %17 = vector.shape_cast %13 : vector<8x8xf32> to vector<1x8x8xf32>
    %18 = vector.shape_cast %14 : vector<8x8xf32> to vector<1x8x8xf32>
    %19 = vector.shape_cast %15 : vector<8x8xf32> to vector<1x8x8xf32>
    %20 = vector.shape_cast %16 : vector<8x8xf32> to vector<1x8x8xf32>
    %21 = tpu.concatenate %17, %18, %19, %20 in 0 : vector<1x8x8xf32>, vector<1x8x8xf32>, vector<1x8x8xf32>, vector<1x8x8xf32> -> vector<4x8x8xf32>
    %22 = vector.extract_strided_slice %11 {offsets = [0, 0], sizes = [8, 8], strides = [1, 1]} : vector<16x32xf32> to vector<8x8xf32>
    %23 = vector.extract_strided_slice %11 {offsets = [0, 8], sizes = [8, 8], strides = [1, 1]} : vector<16x32xf32> to vector<8x8xf32>
    %24 = vector.extract_strided_slice %11 {offsets = [0, 16], sizes = [8, 8], strides = [1, 1]} : vector<16x32xf32> to vector<8x8xf32>
    %25 = vector.extract_strided_slice %11 {offsets = [0, 24], sizes = [8, 8], strides = [1, 1]} : vector<16x32xf32> to vector<8x8xf32>
    %26 = vector.shape_cast %22 : vector<8x8xf32> to vector<1x8x8xf32>
    %27 = vector.shape_cast %23 : vector<8x8xf32> to vector<1x8x8xf32>
    %28 = vector.shape_cast %24 : vector<8x8xf32> to vector<1x8x8xf32>
    %29 = vector.shape_cast %25 : vector<8x8xf32> to vector<1x8x8xf32>
    %30 = tpu.concatenate %26, %27, %28, %29 in 0 : vector<1x8x8xf32>, vector<1x8x8xf32>, vector<1x8x8xf32>, vector<1x8x8xf32> -> vector<4x8x8xf32>
    %31 = vector.extract_strided_slice %12 {offsets = [0, 0], sizes = [8, 8], strides = [1, 1]} : vector<16x32xf32> to vector<8x8xf32>
    %32 = vector.extract_strided_slice %12 {offsets = [0, 8], sizes = [8, 8], strides = [1, 1]} : vector<16x32xf32> to vector<8x8xf32>
    %33 = vector.extract_strided_slice %12 {offsets = [0, 16], sizes = [8, 8], strides = [1, 1]} : vector<16x32xf32> to vector<8x8xf32>
    %34 = vector.extract_strided_slice %12 {offsets = [0, 24], sizes = [8, 8], strides = [1, 1]} : vector<16x32xf32> to vector<8x8xf32>
    %35 = vector.shape_cast %31 : vector<8x8xf32> to vector<1x8x8xf32>
    %36 = vector.shape_cast %32 : vector<8x8xf32> to vector<1x8x8xf32>
    %37 = vector.shape_cast %33 : vector<8x8xf32> to vector<1x8x8xf32>
    %38 = vector.shape_cast %34 : vector<8x8xf32> to vector<1x8x8xf32>
    %39 = tpu.concatenate %35, %36, %37, %38 in 0 : vector<1x8x8xf32>, vector<1x8x8xf32>, vector<1x8x8xf32>, vector<1x8x8xf32> -> vector<4x8x8xf32>
    "tpu.trace_start"() <{level = 10 : i32, message = "hqd,hkd->hqk"}> : () -> ()
    %cst_8 = arith.constant dense<0.000000e+00> : vector<4x8x8xf32>
    %40 = tpu.matmul %21, %30, %cst_8 {dimension_numbers = #tpu.dot_dimension_numbers<[2], [2], [1], [1], [0, 0, 0, 1, 1, 1], [0], [0]>} : vector<4x8x8xf32>, vector<4x8x8xf32>, vector<4x8x8xf32> -> vector<4x8x8xf32>
    "tpu.trace_stop"() : () -> ()
    %cst_9 = arith.constant dense<0xFF800000> : vector<4x8xf32>
    %41 = vector.multi_reduction <maximumf>, %40, %cst_9 [2] : vector<4x8x8xf32> to vector<4x8xf32>
    %42 = vector.shape_cast %41 : vector<4x8xf32> to vector<4x8x1xf32>
    %43 = vector.broadcast %42 : vector<4x8x1xf32> to vector<4x8x8xf32>
    %44 = arith.subf %40, %43 : vector<4x8x8xf32>
    %45 = math.exp %44 : vector<4x8x8xf32>
    %cst_10 = arith.constant dense<0.000000e+00> : vector<4x8xf32>
    %46 = vector.multi_reduction <add>, %45, %cst_10 [2] : vector<4x8x8xf32> to vector<4x8xf32>
    %47 = vector.shape_cast %46 : vector<4x8xf32> to vector<4x8x1xf32>
    %48 = tpu.reciprocal %47 : vector<4x8x1xf32> -> vector<4x8x1xf32>
    %49 = vector.broadcast %48 : vector<4x8x1xf32> to vector<4x8x8xf32>
    %50 = arith.mulf %45, %49 : vector<4x8x8xf32>
    "tpu.trace_start"() <{level = 10 : i32, message = "hqk,hkd->hqd"}> : () -> ()
    %cst_11 = arith.constant dense<0.000000e+00> : vector<4x8x8xf32>
    %51 = tpu.matmul %50, %39, %cst_11 {dimension_numbers = #tpu.dot_dimension_numbers<[2], [1], [1], [2], [0, 0, 0, 1, 1, 2], [0], [0]>} : vector<4x8x8xf32>, vector<4x8x8xf32>, vector<4x8x8xf32> -> vector<4x8x8xf32>
    "tpu.trace_stop"() : () -> ()
    %52 = vector.extract_strided_slice %51 {offsets = [0, 0, 0], sizes = [1, 8, 8], strides = [1, 1, 1]} : vector<4x8x8xf32> to vector<1x8x8xf32>
    %53 = vector.shape_cast %52 : vector<1x8x8xf32> to vector<8x8xf32>
    %54 = vector.extract_strided_slice %51 {offsets = [1, 0, 0], sizes = [1, 8, 8], strides = [1, 1, 1]} : vector<4x8x8xf32> to vector<1x8x8xf32>
    %55 = vector.shape_cast %54 : vector<1x8x8xf32> to vector<8x8xf32>
    %56 = vector.extract_strided_slice %51 {offsets = [2, 0, 0], sizes = [1, 8, 8], strides = [1, 1, 1]} : vector<4x8x8xf32> to vector<1x8x8xf32>
    %57 = vector.shape_cast %56 : vector<1x8x8xf32> to vector<8x8xf32>
    %58 = vector.extract_strided_slice %51 {offsets = [3, 0, 0], sizes = [1, 8, 8], strides = [1, 1, 1]} : vector<4x8x8xf32> to vector<1x8x8xf32>
    %59 = vector.shape_cast %58 : vector<1x8x8xf32> to vector<8x8xf32>
    %60 = tpu.concatenate %53, %55, %57, %59 in 1 : vector<8x8xf32>, vector<8x8xf32>, vector<8x8xf32>, vector<8x8xf32> -> vector<8x32xf32>
    %61 = vector.extract_strided_slice %10 {offsets = [8, 0], sizes = [8, 8], strides = [1, 1]} : vector<16x32xf32> to vector<8x8xf32>
    %62 = vector.extract_strided_slice %10 {offsets = [8, 8], sizes = [8, 8], strides = [1, 1]} : vector<16x32xf32> to vector<8x8xf32>
    %63 = vector.extract_strided_slice %10 {offsets = [8, 16], sizes = [8, 8], strides = [1, 1]} : vector<16x32xf32> to vector<8x8xf32>
    %64 = vector.extract_strided_slice %10 {offsets = [8, 24], sizes = [8, 8], strides = [1, 1]} : vector<16x32xf32> to vector<8x8xf32>
    %65 = vector.shape_cast %61 : vector<8x8xf32> to vector<1x8x8xf32>
    %66 = vector.shape_cast %62 : vector<8x8xf32> to vector<1x8x8xf32>
    %67 = vector.shape_cast %63 : vector<8x8xf32> to vector<1x8x8xf32>
    %68 = vector.shape_cast %64 : vector<8x8xf32> to vector<1x8x8xf32>
    %69 = tpu.concatenate %65, %66, %67, %68 in 0 : vector<1x8x8xf32>, vector<1x8x8xf32>, vector<1x8x8xf32>, vector<1x8x8xf32> -> vector<4x8x8xf32>
    %70 = vector.extract_strided_slice %11 {offsets = [8, 0], sizes = [8, 8], strides = [1, 1]} : vector<16x32xf32> to vector<8x8xf32>
    %71 = vector.extract_strided_slice %11 {offsets = [8, 8], sizes = [8, 8], strides = [1, 1]} : vector<16x32xf32> to vector<8x8xf32>
    %72 = vector.extract_strided_slice %11 {offsets = [8, 16], sizes = [8, 8], strides = [1, 1]} : vector<16x32xf32> to vector<8x8xf32>
    %73 = vector.extract_strided_slice %11 {offsets = [8, 24], sizes = [8, 8], strides = [1, 1]} : vector<16x32xf32> to vector<8x8xf32>
    %74 = vector.shape_cast %70 : vector<8x8xf32> to vector<1x8x8xf32>
    %75 = vector.shape_cast %71 : vector<8x8xf32> to vector<1x8x8xf32>
    %76 = vector.shape_cast %72 : vector<8x8xf32> to vector<1x8x8xf32>
    %77 = vector.shape_cast %73 : vector<8x8xf32> to vector<1x8x8xf32>
    %78 = tpu.concatenate %74, %75, %76, %77 in 0 : vector<1x8x8xf32>, vector<1x8x8xf32>, vector<1x8x8xf32>, vector<1x8x8xf32> -> vector<4x8x8xf32>
    %79 = vector.extract_strided_slice %12 {offsets = [8, 0], sizes = [8, 8], strides = [1, 1]} : vector<16x32xf32> to vector<8x8xf32>
    %80 = vector.extract_strided_slice %12 {offsets = [8, 8], sizes = [8, 8], strides = [1, 1]} : vector<16x32xf32> to vector<8x8xf32>
    %81 = vector.extract_strided_slice %12 {offsets = [8, 16], sizes = [8, 8], strides = [1, 1]} : vector<16x32xf32> to vector<8x8xf32>
    %82 = vector.extract_strided_slice %12 {offsets = [8, 24], sizes = [8, 8], strides = [1, 1]} : vector<16x32xf32> to vector<8x8xf32>
    %83 = vector.shape_cast %79 : vector<8x8xf32> to vector<1x8x8xf32>
    %84 = vector.shape_cast %80 : vector<8x8xf32> to vector<1x8x8xf32>
    %85 = vector.shape_cast %81 : vector<8x8xf32> to vector<1x8x8xf32>
    %86 = vector.shape_cast %82 : vector<8x8xf32> to vector<1x8x8xf32>
    %87 = tpu.concatenate %83, %84, %85, %86 in 0 : vector<1x8x8xf32>, vector<1x8x8xf32>, vector<1x8x8xf32>, vector<1x8x8xf32> -> vector<4x8x8xf32>
    "tpu.trace_start"() <{level = 10 : i32, message = "hqd,hkd->hqk"}> : () -> ()
    %cst_12 = arith.constant dense<0.000000e+00> : vector<4x8x8xf32>
    %88 = tpu.matmul %69, %78, %cst_12 {dimension_numbers = #tpu.dot_dimension_numbers<[2], [2], [1], [1], [0, 0, 0, 1, 1, 1], [0], [0]>} : vector<4x8x8xf32>, vector<4x8x8xf32>, vector<4x8x8xf32> -> vector<4x8x8xf32>
    "tpu.trace_stop"() : () -> ()
    %cst_13 = arith.constant dense<0xFF800000> : vector<4x8xf32>
    %89 = vector.multi_reduction <maximumf>, %88, %cst_13 [2] : vector<4x8x8xf32> to vector<4x8xf32>
    %90 = vector.shape_cast %89 : vector<4x8xf32> to vector<4x8x1xf32>
    %91 = vector.broadcast %90 : vector<4x8x1xf32> to vector<4x8x8xf32>
    %92 = arith.subf %88, %91 : vector<4x8x8xf32>
    %93 = math.exp %92 : vector<4x8x8xf32>
    %cst_14 = arith.constant dense<0.000000e+00> : vector<4x8xf32>
    %94 = vector.multi_reduction <add>, %93, %cst_14 [2] : vector<4x8x8xf32> to vector<4x8xf32>
    %95 = vector.shape_cast %94 : vector<4x8xf32> to vector<4x8x1xf32>
    %96 = tpu.reciprocal %95 : vector<4x8x1xf32> -> vector<4x8x1xf32>
    %97 = vector.broadcast %96 : vector<4x8x1xf32> to vector<4x8x8xf32>
    %98 = arith.mulf %93, %97 : vector<4x8x8xf32>
    "tpu.trace_start"() <{level = 10 : i32, message = "hqk,hkd->hqd"}> : () -> ()
    %cst_15 = arith.constant dense<0.000000e+00> : vector<4x8x8xf32>
    %99 = tpu.matmul %98, %87, %cst_15 {dimension_numbers = #tpu.dot_dimension_numbers<[2], [1], [1], [2], [0, 0, 0, 1, 1, 2], [0], [0]>} : vector<4x8x8xf32>, vector<4x8x8xf32>, vector<4x8x8xf32> -> vector<4x8x8xf32>
    "tpu.trace_stop"() : () -> ()
    %100 = vector.extract_strided_slice %99 {offsets = [0, 0, 0], sizes = [1, 8, 8], strides = [1, 1, 1]} : vector<4x8x8xf32> to vector<1x8x8xf32>
    %101 = vector.shape_cast %100 : vector<1x8x8xf32> to vector<8x8xf32>
    %102 = vector.extract_strided_slice %99 {offsets = [1, 0, 0], sizes = [1, 8, 8], strides = [1, 1, 1]} : vector<4x8x8xf32> to vector<1x8x8xf32>
    %103 = vector.shape_cast %102 : vector<1x8x8xf32> to vector<8x8xf32>
    %104 = vector.extract_strided_slice %99 {offsets = [2, 0, 0], sizes = [1, 8, 8], strides = [1, 1, 1]} : vector<4x8x8xf32> to vector<1x8x8xf32>
    %105 = vector.shape_cast %104 : vector<1x8x8xf32> to vector<8x8xf32>
    %106 = vector.extract_strided_slice %99 {offsets = [3, 0, 0], sizes = [1, 8, 8], strides = [1, 1, 1]} : vector<4x8x8xf32> to vector<1x8x8xf32>
    %107 = vector.shape_cast %106 : vector<1x8x8xf32> to vector<8x8xf32>
    %108 = tpu.concatenate %101, %103, %105, %107 in 1 : vector<8x8xf32>, vector<8x8xf32>, vector<8x8xf32>, vector<8x8xf32> -> vector<8x32xf32>
    %109 = tpu.concatenate %60, %108 in 0 : vector<8x32xf32>, vector<8x32xf32> -> vector<16x32xf32>
    %c0_16 = arith.constant 0 : index
    %c0_17 = arith.constant 0 : index
    %110 = vector.load %arg5[%c0_16, %c0_17] : memref<32x32xf32, #tpu.memory_space<vmem>>, vector<32x32xf32>
    %cst_18 = arith.constant dense<0.000000e+00> : vector<16x32xf32>
    %111 = tpu.matmul %109, %110, %cst_18 {dimension_numbers = #tpu.dot_dimension_numbers<[1], [0], [0], [1], [0, 0, 1, 1], [], []>} : vector<16x32xf32>, vector<32x32xf32>, vector<16x32xf32> -> vector<16x32xf32>
    %c0_19 = arith.constant 0 : index
    %c0_20 = arith.constant 0 : index
    %112 = vector.load %arg6[%c0_19, %c0_20] : memref<1x32xf32, #tpu.memory_space<vmem>>, vector<1x32xf32>
    %113 = vector.broadcast %112 : vector<1x32xf32> to vector<16x32xf32>
    %114 = arith.addf %111, %113 : vector<16x32xf32>
    %115 = arith.addf %4, %114 : vector<16x32xf32>
    %116 = vector.extract_strided_slice %3 {offsets = [0, 0], sizes = [1, 32], strides = [1, 1]} : vector<6x32xf32> to vector<1x32xf32>
    %117 = vector.shape_cast %116 : vector<1x32xf32> to vector<32xf32>
    %118 = vector.extract_strided_slice %3 {offsets = [1, 0], sizes = [1, 32], strides = [1, 1]} : vector<6x32xf32> to vector<1x32xf32>
    %119 = vector.shape_cast %118 : vector<1x32xf32> to vector<32xf32>
    %cst_21 = arith.constant dense<0.000000e+00> : vector<16xf32>
    %120 = vector.multi_reduction <add>, %115, %cst_21 [1] : vector<16x32xf32> to vector<16xf32>
    %121 = vector.shape_cast %120 : vector<16xf32> to vector<16x1xf32>
    %cst_22 = arith.constant 3.200000e+01 : f32
    %122 = vector.broadcast %cst_22 : f32 to vector<16x1xf32>
    %123 = arith.divf %121, %122 : vector<16x1xf32>
    %124 = vector.broadcast %123 : vector<16x1xf32> to vector<16x32xf32>
    %125 = arith.subf %115, %124 : vector<16x32xf32>
    %126 = arith.mulf %125, %125 : vector<16x32xf32>
    %cst_23 = arith.constant dense<0.000000e+00> : vector<16xf32>
    %127 = vector.multi_reduction <add>, %126, %cst_23 [1] : vector<16x32xf32> to vector<16xf32>
    %128 = vector.shape_cast %127 : vector<16xf32> to vector<16x1xf32>
    %cst_24 = arith.constant 3.200000e+01 : f32
    %129 = vector.broadcast %cst_24 : f32 to vector<16x1xf32>
    %130 = arith.divf %128, %129 : vector<16x1xf32>
    %131 = vector.broadcast %123 : vector<16x1xf32> to vector<16x32xf32>
    %132 = arith.subf %115, %131 : vector<16x32xf32>
    %cst_25 = arith.constant 9.99999997E-7 : f32
    %133 = vector.broadcast %cst_25 : f32 to vector<16x1xf32>
    %134 = arith.addf %130, %133 : vector<16x1xf32>
    %135 = math.rsqrt %134 : vector<16x1xf32>
    %136 = vector.broadcast %135 : vector<16x1xf32> to vector<16x32xf32>
    %137 = arith.mulf %132, %136 : vector<16x32xf32>
    %138 = vector.shape_cast %117 : vector<32xf32> to vector<1x32xf32>
    %139 = vector.broadcast %138 : vector<1x32xf32> to vector<16x32xf32>
    %140 = arith.mulf %137, %139 : vector<16x32xf32>
    %141 = vector.shape_cast %119 : vector<32xf32> to vector<1x32xf32>
    %142 = vector.broadcast %141 : vector<1x32xf32> to vector<16x32xf32>
    %143 = arith.addf %140, %142 : vector<16x32xf32>
    %c0_26 = arith.constant 0 : index
    %c0_27 = arith.constant 0 : index
    %144 = vector.load %arg7[%c0_26, %c0_27] : memref<32x32xf32, #tpu.memory_space<vmem>>, vector<32x32xf32>
    %cst_28 = arith.constant dense<0.000000e+00> : vector<16x32xf32>
    %145 = tpu.matmul %143, %144, %cst_28 {dimension_numbers = #tpu.dot_dimension_numbers<[1], [0], [0], [1], [0, 0, 1, 1], [], []>} : vector<16x32xf32>, vector<32x32xf32>, vector<16x32xf32> -> vector<16x32xf32>
    %c0_29 = arith.constant 0 : index
    %c0_30 = arith.constant 0 : index
    %146 = vector.load %arg8[%c0_29, %c0_30] : memref<1x32xf32, #tpu.memory_space<vmem>>, vector<1x32xf32>
    %147 = vector.broadcast %146 : vector<1x32xf32> to vector<16x32xf32>
    %148 = arith.addf %145, %147 : vector<16x32xf32>
    %c0_31 = arith.constant 0 : index
    %c0_32 = arith.constant 0 : index
    %149 = vector.load %arg20[%c0_31, %c0_32] : memref<16x64xf32, #tpu.memory_space<vmem>>, vector<16x64xf32>
    %150 = vector.extract_strided_slice %149 {offsets = [0, 0], sizes = [16, 32], strides = [1, 1]} : vector<16x64xf32> to vector<16x32xf32>
    %151 = vector.extract_strided_slice %149 {offsets = [0, 32], sizes = [16, 32], strides = [1, 1]} : vector<16x64xf32> to vector<16x32xf32>
    %152 = vector.extract_strided_slice %148 {offsets = [0, 0], sizes = [8, 8], strides = [1, 1]} : vector<16x32xf32> to vector<8x8xf32>
    %153 = vector.extract_strided_slice %148 {offsets = [0, 8], sizes = [8, 8], strides = [1, 1]} : vector<16x32xf32> to vector<8x8xf32>
    %154 = vector.extract_strided_slice %148 {offsets = [0, 16], sizes = [8, 8], strides = [1, 1]} : vector<16x32xf32> to vector<8x8xf32>
    %155 = vector.extract_strided_slice %148 {offsets = [0, 24], sizes = [8, 8], strides = [1, 1]} : vector<16x32xf32> to vector<8x8xf32>
    %156 = vector.shape_cast %152 : vector<8x8xf32> to vector<1x8x8xf32>
    %157 = vector.shape_cast %153 : vector<8x8xf32> to vector<1x8x8xf32>
    %158 = vector.shape_cast %154 : vector<8x8xf32> to vector<1x8x8xf32>
    %159 = vector.shape_cast %155 : vector<8x8xf32> to vector<1x8x8xf32>
    %160 = tpu.concatenate %156, %157, %158, %159 in 0 : vector<1x8x8xf32>, vector<1x8x8xf32>, vector<1x8x8xf32>, vector<1x8x8xf32> -> vector<4x8x8xf32>
    %161 = vector.extract_strided_slice %150 {offsets = [0, 0], sizes = [8, 8], strides = [1, 1]} : vector<16x32xf32> to vector<8x8xf32>
    %162 = vector.extract_strided_slice %150 {offsets = [0, 8], sizes = [8, 8], strides = [1, 1]} : vector<16x32xf32> to vector<8x8xf32>
    %163 = vector.extract_strided_slice %150 {offsets = [0, 16], sizes = [8, 8], strides = [1, 1]} : vector<16x32xf32> to vector<8x8xf32>
    %164 = vector.extract_strided_slice %150 {offsets = [0, 24], sizes = [8, 8], strides = [1, 1]} : vector<16x32xf32> to vector<8x8xf32>
    %165 = vector.shape_cast %161 : vector<8x8xf32> to vector<1x8x8xf32>
    %166 = vector.shape_cast %162 : vector<8x8xf32> to vector<1x8x8xf32>
    %167 = vector.shape_cast %163 : vector<8x8xf32> to vector<1x8x8xf32>
    %168 = vector.shape_cast %164 : vector<8x8xf32> to vector<1x8x8xf32>
    %169 = tpu.concatenate %165, %166, %167, %168 in 0 : vector<1x8x8xf32>, vector<1x8x8xf32>, vector<1x8x8xf32>, vector<1x8x8xf32> -> vector<4x8x8xf32>
    %170 = vector.extract_strided_slice %151 {offsets = [0, 0], sizes = [8, 8], strides = [1, 1]} : vector<16x32xf32> to vector<8x8xf32>
    %171 = vector.extract_strided_slice %151 {offsets = [0, 8], sizes = [8, 8], strides = [1, 1]} : vector<16x32xf32> to vector<8x8xf32>
    %172 = vector.extract_strided_slice %151 {offsets = [0, 16], sizes = [8, 8], strides = [1, 1]} : vector<16x32xf32> to vector<8x8xf32>
    %173 = vector.extract_strided_slice %151 {offsets = [0, 24], sizes = [8, 8], strides = [1, 1]} : vector<16x32xf32> to vector<8x8xf32>
    %174 = vector.shape_cast %170 : vector<8x8xf32> to vector<1x8x8xf32>
    %175 = vector.shape_cast %171 : vector<8x8xf32> to vector<1x8x8xf32>
    %176 = vector.shape_cast %172 : vector<8x8xf32> to vector<1x8x8xf32>
    %177 = vector.shape_cast %173 : vector<8x8xf32> to vector<1x8x8xf32>
    %178 = tpu.concatenate %174, %175, %176, %177 in 0 : vector<1x8x8xf32>, vector<1x8x8xf32>, vector<1x8x8xf32>, vector<1x8x8xf32> -> vector<4x8x8xf32>
    "tpu.trace_start"() <{level = 10 : i32, message = "hqd,hkd->hqk"}> : () -> ()
    %cst_33 = arith.constant dense<0.000000e+00> : vector<4x8x8xf32>
    %179 = tpu.matmul %160, %169, %cst_33 {dimension_numbers = #tpu.dot_dimension_numbers<[2], [2], [1], [1], [0, 0, 0, 1, 1, 1], [0], [0]>} : vector<4x8x8xf32>, vector<4x8x8xf32>, vector<4x8x8xf32> -> vector<4x8x8xf32>
    "tpu.trace_stop"() : () -> ()
    %cst_34 = arith.constant dense<0xFF800000> : vector<4x8xf32>
    %180 = vector.multi_reduction <maximumf>, %179, %cst_34 [2] : vector<4x8x8xf32> to vector<4x8xf32>
    %181 = vector.shape_cast %180 : vector<4x8xf32> to vector<4x8x1xf32>
    %182 = vector.broadcast %181 : vector<4x8x1xf32> to vector<4x8x8xf32>
    %183 = arith.subf %179, %182 : vector<4x8x8xf32>
    %184 = math.exp %183 : vector<4x8x8xf32>
    %cst_35 = arith.constant dense<0.000000e+00> : vector<4x8xf32>
    %185 = vector.multi_reduction <add>, %184, %cst_35 [2] : vector<4x8x8xf32> to vector<4x8xf32>
    %186 = vector.shape_cast %185 : vector<4x8xf32> to vector<4x8x1xf32>
    %187 = tpu.reciprocal %186 : vector<4x8x1xf32> -> vector<4x8x1xf32>
    %188 = vector.broadcast %187 : vector<4x8x1xf32> to vector<4x8x8xf32>
    %189 = arith.mulf %184, %188 : vector<4x8x8xf32>
    "tpu.trace_start"() <{level = 10 : i32, message = "hqk,hkd->hqd"}> : () -> ()
    %cst_36 = arith.constant dense<0.000000e+00> : vector<4x8x8xf32>
    %190 = tpu.matmul %189, %178, %cst_36 {dimension_numbers = #tpu.dot_dimension_numbers<[2], [1], [1], [2], [0, 0, 0, 1, 1, 2], [0], [0]>} : vector<4x8x8xf32>, vector<4x8x8xf32>, vector<4x8x8xf32> -> vector<4x8x8xf32>
    "tpu.trace_stop"() : () -> ()
    %191 = vector.extract_strided_slice %190 {offsets = [0, 0, 0], sizes = [1, 8, 8], strides = [1, 1, 1]} : vector<4x8x8xf32> to vector<1x8x8xf32>
    %192 = vector.shape_cast %191 : vector<1x8x8xf32> to vector<8x8xf32>
    %193 = vector.extract_strided_slice %190 {offsets = [1, 0, 0], sizes = [1, 8, 8], strides = [1, 1, 1]} : vector<4x8x8xf32> to vector<1x8x8xf32>
    %194 = vector.shape_cast %193 : vector<1x8x8xf32> to vector<8x8xf32>
    %195 = vector.extract_strided_slice %190 {offsets = [2, 0, 0], sizes = [1, 8, 8], strides = [1, 1, 1]} : vector<4x8x8xf32> to vector<1x8x8xf32>
    %196 = vector.shape_cast %195 : vector<1x8x8xf32> to vector<8x8xf32>
    %197 = vector.extract_strided_slice %190 {offsets = [3, 0, 0], sizes = [1, 8, 8], strides = [1, 1, 1]} : vector<4x8x8xf32> to vector<1x8x8xf32>
    %198 = vector.shape_cast %197 : vector<1x8x8xf32> to vector<8x8xf32>
    %199 = tpu.concatenate %192, %194, %196, %198 in 1 : vector<8x8xf32>, vector<8x8xf32>, vector<8x8xf32>, vector<8x8xf32> -> vector<8x32xf32>
    %200 = vector.extract_strided_slice %148 {offsets = [8, 0], sizes = [8, 8], strides = [1, 1]} : vector<16x32xf32> to vector<8x8xf32>
    %201 = vector.extract_strided_slice %148 {offsets = [8, 8], sizes = [8, 8], strides = [1, 1]} : vector<16x32xf32> to vector<8x8xf32>
    %202 = vector.extract_strided_slice %148 {offsets = [8, 16], sizes = [8, 8], strides = [1, 1]} : vector<16x32xf32> to vector<8x8xf32>
    %203 = vector.extract_strided_slice %148 {offsets = [8, 24], sizes = [8, 8], strides = [1, 1]} : vector<16x32xf32> to vector<8x8xf32>
    %204 = vector.shape_cast %200 : vector<8x8xf32> to vector<1x8x8xf32>
    %205 = vector.shape_cast %201 : vector<8x8xf32> to vector<1x8x8xf32>
    %206 = vector.shape_cast %202 : vector<8x8xf32> to vector<1x8x8xf32>
    %207 = vector.shape_cast %203 : vector<8x8xf32> to vector<1x8x8xf32>
    %208 = tpu.concatenate %204, %205, %206, %207 in 0 : vector<1x8x8xf32>, vector<1x8x8xf32>, vector<1x8x8xf32>, vector<1x8x8xf32> -> vector<4x8x8xf32>
    %209 = vector.extract_strided_slice %150 {offsets = [8, 0], sizes = [8, 8], strides = [1, 1]} : vector<16x32xf32> to vector<8x8xf32>
    %210 = vector.extract_strided_slice %150 {offsets = [8, 8], sizes = [8, 8], strides = [1, 1]} : vector<16x32xf32> to vector<8x8xf32>
    %211 = vector.extract_strided_slice %150 {offsets = [8, 16], sizes = [8, 8], strides = [1, 1]} : vector<16x32xf32> to vector<8x8xf32>
    %212 = vector.extract_strided_slice %150 {offsets = [8, 24], sizes = [8, 8], strides = [1, 1]} : vector<16x32xf32> to vector<8x8xf32>
    %213 = vector.shape_cast %209 : vector<8x8xf32> to vector<1x8x8xf32>
    %214 = vector.shape_cast %210 : vector<8x8xf32> to vector<1x8x8xf32>
    %215 = vector.shape_cast %211 : vector<8x8xf32> to vector<1x8x8xf32>
    %216 = vector.shape_cast %212 : vector<8x8xf32> to vector<1x8x8xf32>
    %217 = tpu.concatenate %213, %214, %215, %216 in 0 : vector<1x8x8xf32>, vector<1x8x8xf32>, vector<1x8x8xf32>, vector<1x8x8xf32> -> vector<4x8x8xf32>
    %218 = vector.extract_strided_slice %151 {offsets = [8, 0], sizes = [8, 8], strides = [1, 1]} : vector<16x32xf32> to vector<8x8xf32>
    %219 = vector.extract_strided_slice %151 {offsets = [8, 8], sizes = [8, 8], strides = [1, 1]} : vector<16x32xf32> to vector<8x8xf32>
    %220 = vector.extract_strided_slice %151 {offsets = [8, 16], sizes = [8, 8], strides = [1, 1]} : vector<16x32xf32> to vector<8x8xf32>
    %221 = vector.extract_strided_slice %151 {offsets = [8, 24], sizes = [8, 8], strides = [1, 1]} : vector<16x32xf32> to vector<8x8xf32>
    %222 = vector.shape_cast %218 : vector<8x8xf32> to vector<1x8x8xf32>
    %223 = vector.shape_cast %219 : vector<8x8xf32> to vector<1x8x8xf32>
    %224 = vector.shape_cast %220 : vector<8x8xf32> to vector<1x8x8xf32>
    %225 = vector.shape_cast %221 : vector<8x8xf32> to vector<1x8x8xf32>
    %226 = tpu.concatenate %222, %223, %224, %225 in 0 : vector<1x8x8xf32>, vector<1x8x8xf32>, vector<1x8x8xf32>, vector<1x8x8xf32> -> vector<4x8x8xf32>
    "tpu.trace_start"() <{level = 10 : i32, message = "hqd,hkd->hqk"}> : () -> ()
    %cst_37 = arith.constant dense<0.000000e+00> : vector<4x8x8xf32>
    %227 = tpu.matmul %208, %217, %cst_37 {dimension_numbers = #tpu.dot_dimension_numbers<[2], [2], [1], [1], [0, 0, 0, 1, 1, 1], [0], [0]>} : vector<4x8x8xf32>, vector<4x8x8xf32>, vector<4x8x8xf32> -> vector<4x8x8xf32>
    "tpu.trace_stop"() : () -> ()
    %cst_38 = arith.constant dense<0xFF800000> : vector<4x8xf32>
    %228 = vector.multi_reduction <maximumf>, %227, %cst_38 [2] : vector<4x8x8xf32> to vector<4x8xf32>
    %229 = vector.shape_cast %228 : vector<4x8xf32> to vector<4x8x1xf32>
    %230 = vector.broadcast %229 : vector<4x8x1xf32> to vector<4x8x8xf32>
    %231 = arith.subf %227, %230 : vector<4x8x8xf32>
    %232 = math.exp %231 : vector<4x8x8xf32>
    %cst_39 = arith.constant dense<0.000000e+00> : vector<4x8xf32>
    %233 = vector.multi_reduction <add>, %232, %cst_39 [2] : vector<4x8x8xf32> to vector<4x8xf32>
    %234 = vector.shape_cast %233 : vector<4x8xf32> to vector<4x8x1xf32>
    %235 = tpu.reciprocal %234 : vector<4x8x1xf32> -> vector<4x8x1xf32>
    %236 = vector.broadcast %235 : vector<4x8x1xf32> to vector<4x8x8xf32>
    %237 = arith.mulf %232, %236 : vector<4x8x8xf32>
    "tpu.trace_start"() <{level = 10 : i32, message = "hqk,hkd->hqd"}> : () -> ()
    %cst_40 = arith.constant dense<0.000000e+00> : vector<4x8x8xf32>
    %238 = tpu.matmul %237, %226, %cst_40 {dimension_numbers = #tpu.dot_dimension_numbers<[2], [1], [1], [2], [0, 0, 0, 1, 1, 2], [0], [0]>} : vector<4x8x8xf32>, vector<4x8x8xf32>, vector<4x8x8xf32> -> vector<4x8x8xf32>
    "tpu.trace_stop"() : () -> ()
    %239 = vector.extract_strided_slice %238 {offsets = [0, 0, 0], sizes = [1, 8, 8], strides = [1, 1, 1]} : vector<4x8x8xf32> to vector<1x8x8xf32>
    %240 = vector.shape_cast %239 : vector<1x8x8xf32> to vector<8x8xf32>
    %241 = vector.extract_strided_slice %238 {offsets = [1, 0, 0], sizes = [1, 8, 8], strides = [1, 1, 1]} : vector<4x8x8xf32> to vector<1x8x8xf32>
    %242 = vector.shape_cast %241 : vector<1x8x8xf32> to vector<8x8xf32>
    %243 = vector.extract_strided_slice %238 {offsets = [2, 0, 0], sizes = [1, 8, 8], strides = [1, 1, 1]} : vector<4x8x8xf32> to vector<1x8x8xf32>
    %244 = vector.shape_cast %243 : vector<1x8x8xf32> to vector<8x8xf32>
    %245 = vector.extract_strided_slice %238 {offsets = [3, 0, 0], sizes = [1, 8, 8], strides = [1, 1, 1]} : vector<4x8x8xf32> to vector<1x8x8xf32>
    %246 = vector.shape_cast %245 : vector<1x8x8xf32> to vector<8x8xf32>
    %247 = tpu.concatenate %240, %242, %244, %246 in 1 : vector<8x8xf32>, vector<8x8xf32>, vector<8x8xf32>, vector<8x8xf32> -> vector<8x32xf32>
    %248 = tpu.concatenate %199, %247 in 0 : vector<8x32xf32>, vector<8x32xf32> -> vector<16x32xf32>
    %c0_41 = arith.constant 0 : index
    %c0_42 = arith.constant 0 : index
    %249 = vector.load %arg11[%c0_41, %c0_42] : memref<32x32xf32, #tpu.memory_space<vmem>>, vector<32x32xf32>
    %cst_43 = arith.constant dense<0.000000e+00> : vector<16x32xf32>
    %250 = tpu.matmul %248, %249, %cst_43 {dimension_numbers = #tpu.dot_dimension_numbers<[1], [0], [0], [1], [0, 0, 1, 1], [], []>} : vector<16x32xf32>, vector<32x32xf32>, vector<16x32xf32> -> vector<16x32xf32>
    %c0_44 = arith.constant 0 : index
    %c0_45 = arith.constant 0 : index
    %251 = vector.load %arg12[%c0_44, %c0_45] : memref<1x32xf32, #tpu.memory_space<vmem>>, vector<1x32xf32>
    %252 = vector.broadcast %251 : vector<1x32xf32> to vector<16x32xf32>
    %253 = arith.addf %250, %252 : vector<16x32xf32>
    %254 = arith.addf %143, %253 : vector<16x32xf32>
    %255 = vector.extract_strided_slice %3 {offsets = [2, 0], sizes = [1, 32], strides = [1, 1]} : vector<6x32xf32> to vector<1x32xf32>
    %256 = vector.shape_cast %255 : vector<1x32xf32> to vector<32xf32>
    %257 = vector.extract_strided_slice %3 {offsets = [3, 0], sizes = [1, 32], strides = [1, 1]} : vector<6x32xf32> to vector<1x32xf32>
    %258 = vector.shape_cast %257 : vector<1x32xf32> to vector<32xf32>
    %cst_46 = arith.constant dense<0.000000e+00> : vector<16xf32>
    %259 = vector.multi_reduction <add>, %254, %cst_46 [1] : vector<16x32xf32> to vector<16xf32>
    %260 = vector.shape_cast %259 : vector<16xf32> to vector<16x1xf32>
    %cst_47 = arith.constant 3.200000e+01 : f32
    %261 = vector.broadcast %cst_47 : f32 to vector<16x1xf32>
    %262 = arith.divf %260, %261 : vector<16x1xf32>
    %263 = vector.broadcast %262 : vector<16x1xf32> to vector<16x32xf32>
    %264 = arith.subf %254, %263 : vector<16x32xf32>
    %265 = arith.mulf %264, %264 : vector<16x32xf32>
    %cst_48 = arith.constant dense<0.000000e+00> : vector<16xf32>
    %266 = vector.multi_reduction <add>, %265, %cst_48 [1] : vector<16x32xf32> to vector<16xf32>
    %267 = vector.shape_cast %266 : vector<16xf32> to vector<16x1xf32>
    %cst_49 = arith.constant 3.200000e+01 : f32
    %268 = vector.broadcast %cst_49 : f32 to vector<16x1xf32>
    %269 = arith.divf %267, %268 : vector<16x1xf32>
    %270 = vector.broadcast %262 : vector<16x1xf32> to vector<16x32xf32>
    %271 = arith.subf %254, %270 : vector<16x32xf32>
    %cst_50 = arith.constant 9.99999974E-6 : f32
    %272 = vector.broadcast %cst_50 : f32 to vector<16x1xf32>
    %273 = arith.addf %269, %272 : vector<16x1xf32>
    %274 = math.rsqrt %273 : vector<16x1xf32>
    %275 = vector.broadcast %274 : vector<16x1xf32> to vector<16x32xf32>
    %276 = arith.mulf %271, %275 : vector<16x32xf32>
    %277 = vector.shape_cast %256 : vector<32xf32> to vector<1x32xf32>
    %278 = vector.broadcast %277 : vector<1x32xf32> to vector<16x32xf32>
    %279 = arith.mulf %276, %278 : vector<16x32xf32>
    %280 = vector.shape_cast %258 : vector<32xf32> to vector<1x32xf32>
    %281 = vector.broadcast %280 : vector<1x32xf32> to vector<16x32xf32>
    %282 = arith.addf %279, %281 : vector<16x32xf32>
    %c0_51 = arith.constant 0 : index
    %c0_52 = arith.constant 0 : index
    %283 = vector.load %arg14[%c0_51, %c0_52] : memref<32x64xf32, #tpu.memory_space<vmem>>, vector<32x64xf32>
    %cst_53 = arith.constant dense<0.000000e+00> : vector<16x64xf32>
    %284 = tpu.matmul %282, %283, %cst_53 {dimension_numbers = #tpu.dot_dimension_numbers<[1], [0], [0], [1], [0, 0, 1, 1], [], []>} : vector<16x32xf32>, vector<32x64xf32>, vector<16x64xf32> -> vector<16x64xf32>
    %c0_54 = arith.constant 0 : index
    %c0_55 = arith.constant 0 : index
    %285 = vector.load %arg15[%c0_54, %c0_55] : memref<1x64xf32, #tpu.memory_space<vmem>>, vector<1x64xf32>
    %286 = vector.broadcast %285 : vector<1x64xf32> to vector<16x64xf32>
    %287 = arith.addf %284, %286 : vector<16x64xf32>
    %cst_56 = arith.constant 0.000000e+00 : f32
    %288 = vector.broadcast %cst_56 : f32 to vector<16x64xf32>
    %289 = arith.maximumf %287, %288 : vector<16x64xf32>
    %c0_57 = arith.constant 0 : index
    %c0_58 = arith.constant 0 : index
    %290 = vector.load %arg16[%c0_57, %c0_58] : memref<64x32xf32, #tpu.memory_space<vmem>>, vector<64x32xf32>
    %cst_59 = arith.constant dense<0.000000e+00> : vector<16x32xf32>
    %291 = tpu.matmul %289, %290, %cst_59 {dimension_numbers = #tpu.dot_dimension_numbers<[1], [0], [0], [1], [0, 0, 1, 1], [], []>} : vector<16x64xf32>, vector<64x32xf32>, vector<16x32xf32> -> vector<16x32xf32>
    %c0_60 = arith.constant 0 : index
    %c0_61 = arith.constant 0 : index
    %292 = vector.load %arg17[%c0_60, %c0_61] : memref<1x32xf32, #tpu.memory_space<vmem>>, vector<1x32xf32>
    %293 = vector.broadcast %292 : vector<1x32xf32> to vector<16x32xf32>
    %294 = arith.addf %291, %293 : vector<16x32xf32>
    %295 = arith.addf %282, %294 : vector<16x32xf32>
    %296 = vector.extract_strided_slice %3 {offsets = [4, 0], sizes = [1, 32], strides = [1, 1]} : vector<6x32xf32> to vector<1x32xf32>
    %297 = vector.shape_cast %296 : vector<1x32xf32> to vector<32xf32>
    %298 = vector.extract_strided_slice %3 {offsets = [5, 0], sizes = [1, 32], strides = [1, 1]} : vector<6x32xf32> to vector<1x32xf32>
    %299 = vector.shape_cast %298 : vector<1x32xf32> to vector<32xf32>
    %cst_62 = arith.constant dense<0.000000e+00> : vector<16xf32>
    %300 = vector.multi_reduction <add>, %295, %cst_62 [1] : vector<16x32xf32> to vector<16xf32>
    %301 = vector.shape_cast %300 : vector<16xf32> to vector<16x1xf32>
    %cst_63 = arith.constant 3.200000e+01 : f32
    %302 = vector.broadcast %cst_63 : f32 to vector<16x1xf32>
    %303 = arith.divf %301, %302 : vector<16x1xf32>
    %304 = vector.broadcast %303 : vector<16x1xf32> to vector<16x32xf32>
    %305 = arith.subf %295, %304 : vector<16x32xf32>
    %306 = arith.mulf %305, %305 : vector<16x32xf32>
    %cst_64 = arith.constant dense<0.000000e+00> : vector<16xf32>
    %307 = vector.multi_reduction <add>, %306, %cst_64 [1] : vector<16x32xf32> to vector<16xf32>
    %308 = vector.shape_cast %307 : vector<16xf32> to vector<16x1xf32>
    %cst_65 = arith.constant 3.200000e+01 : f32
    %309 = vector.broadcast %cst_65 : f32 to vector<16x1xf32>
    %310 = arith.divf %308, %309 : vector<16x1xf32>
    %311 = vector.broadcast %303 : vector<16x1xf32> to vector<16x32xf32>
    %312 = arith.subf %295, %311 : vector<16x32xf32>
    %cst_66 = arith.constant 9.99999997E-7 : f32
    %313 = vector.broadcast %cst_66 : f32 to vector<16x1xf32>
    %314 = arith.addf %310, %313 : vector<16x1xf32>
    %315 = math.rsqrt %314 : vector<16x1xf32>
    %316 = vector.broadcast %315 : vector<16x1xf32> to vector<16x32xf32>
    %317 = arith.mulf %312, %316 : vector<16x32xf32>
    %318 = vector.shape_cast %297 : vector<32xf32> to vector<1x32xf32>
    %319 = vector.broadcast %318 : vector<1x32xf32> to vector<16x32xf32>
    %320 = arith.mulf %317, %319 : vector<16x32xf32>
    %321 = vector.shape_cast %299 : vector<32xf32> to vector<1x32xf32>
    %322 = vector.broadcast %321 : vector<1x32xf32> to vector<16x32xf32>
    %323 = arith.addf %320, %322 : vector<16x32xf32>
    %c0_67 = arith.constant 0 : index
    %c0_68 = arith.constant 0 : index
    %324 = vector.load %arg19[%c0_67, %c0_68] : memref<16x32xf32, #tpu.memory_space<vmem>>, vector<16x32xf32>
    tpu.vector_store %arg19[%c0_67, %c0_68], %323 {strides = array<i32>} : memref<16x32xf32, #tpu.memory_space<vmem>>, vector<16x32xf32>,
    %c0_69 = arith.constant 0 : index
    %c0_70 = arith.constant 0 : index
    %325 = vector.load %arg18[%c0_69, %c0_70] : memref<16x32xf32, #tpu.memory_space<vmem>>, vector<16x32xf32>
    tpu.vector_store %arg18[%c0_69, %c0_70], %323 {strides = array<i32>} : memref<16x32xf32, #tpu.memory_space<vmem>>, vector<16x32xf32>,
    return
  }
  func.func @transform_0(%arg0: i32) -> (i32, i32) {
    %c0_i32 = arith.constant 0 : i32
    %c0_i32_0 = arith.constant 0 : i32
    %c0_i32_1 = arith.constant 0 : i32
    return %c0_i32, %c0_i32_0 : i32, i32
  }
  func.func @transform_1(%arg0: i32) -> (i32, i32) {
    %c0_i32 = arith.constant 0 : i32
    %c0_i32_0 = arith.constant 0 : i32
    %c0_i32_1 = arith.constant 0 : i32
    return %c0_i32, %c0_i32_0 : i32, i32
  }
  func.func @transform_2(%arg0: i32) -> (i32, i32) {
    %c0_i32 = arith.constant 0 : i32
    %c0_i32_0 = arith.constant 0 : i32
    %c0_i32_1 = arith.constant 0 : i32
    return %c0_i32, %c0_i32_0 : i32, i32
  }
  func.func @transform_3(%arg0: i32) -> (i32, i32) {
    %c0_i32 = arith.constant 0 : i32
    %c0_i32_0 = arith.constant 0 : i32
    %c0_i32_1 = arith.constant 0 : i32
    return %c0_i32, %c0_i32_0 : i32, i32
  }
  func.func @transform_4(%arg0: i32) -> (i32, i32) {
    %c0_i32 = arith.constant 0 : i32
    %c0_i32_0 = arith.constant 0 : i32
    %c0_i32_1 = arith.constant 0 : i32
    return %c0_i32, %c0_i32_0 : i32, i32
  }
  func.func @transform_5(%arg0: i32) -> (i32, i32) {
    %c0_i32 = arith.constant 0 : i32
    %c0_i32_0 = arith.constant 0 : i32
    %c0_i32_1 = arith.constant 0 : i32
    return %c0_i32, %c0_i32_0 : i32, i32
  }
  func.func @transform_6(%arg0: i32) -> (i32, i32) {
    %c0_i32 = arith.constant 0 : i32
    %c0_i32_0 = arith.constant 0 : i32
    %c0_i32_1 = arith.constant 0 : i32
    return %c0_i32, %c0_i32_0 : i32, i32
  }
  func.func @transform_7(%arg0: i32) -> (i32, i32) {
    %c0_i32 = arith.constant 0 : i32
    %c0_i32_0 = arith.constant 0 : i32
    %c0_i32_1 = arith.constant 0 : i32
    return %c0_i32, %c0_i32_0 : i32, i32
  }
  func.func @transform_8(%arg0: i32) -> (i32, i32) {
    %c0_i32 = arith.constant 0 : i32
    %c0_i32_0 = arith.constant 0 : i32
    %c0_i32_1 = arith.constant 0 : i32
    return %c0_i32, %c0_i32_0 : i32, i32
  }
  func.func @transform_9(%arg0: i32) -> (i32, i32) {
    %c0_i32 = arith.constant 0 : i32
    %c0_i32_0 = arith.constant 0 : i32
    %c0_i32_1 = arith.constant 0 : i32
    return %c0_i32, %c0_i32_0 : i32, i32
  }
  func.func @transform_10(%arg0: i32) -> (i32, i32) {
    %c0_i32 = arith.constant 0 : i32
    %c0_i32_0 = arith.constant 0 : i32
    %c0_i32_1 = arith.constant 0 : i32
    return %c0_i32, %c0_i32_0 : i32, i32
  }
  func.func @transform_11(%arg0: i32) -> (i32, i32) {
    %c0_i32 = arith.constant 0 : i32
    %c0_i32_0 = arith.constant 0 : i32
    %c0_i32_1 = arith.constant 0 : i32
    return %c0_i32, %c0_i32_0 : i32, i32
  }
  func.func @transform_12(%arg0: i32) -> (i32, i32) {
    %c0_i32 = arith.constant 0 : i32
    %c0_i32_0 = arith.constant 0 : i32
    %c0_i32_1 = arith.constant 0 : i32
    return %c0_i32, %c0_i32_0 : i32, i32
  }
  func.func @transform_13(%arg0: i32) -> (i32, i32) {
    %c0_i32 = arith.constant 0 : i32
    %c0_i32_0 = arith.constant 0 : i32
    %c0_i32_1 = arith.constant 0 : i32
    return %c0_i32, %c0_i32_0 : i32, i32
  }
  func.func @transform_14(%arg0: i32) -> (i32, i32) {
    %c0_i32 = arith.constant 0 : i32
    %c0_i32_0 = arith.constant 0 : i32
    %c0_i32_1 = arith.constant 0 : i32
    return %c0_i32, %c0_i32_0 : i32, i32
  }
  func.func @transform_15(%arg0: i32) -> (i32, i32) {
    %c0_i32 = arith.constant 0 : i32
    %c0_i32_0 = arith.constant 0 : i32
    %c0_i32_1 = arith.constant 0 : i32
    return %c0_i32, %c0_i32_0 : i32, i32
  }
  func.func @transform_16(%arg0: i32) -> (i32, i32) {
    %c0_i32 = arith.constant 0 : i32
    %c0_i32_0 = arith.constant 0 : i32
    %c0_i32_1 = arith.constant 0 : i32
    return %c0_i32, %c0_i32_0 : i32, i32
  }
  func.func @transform_17(%arg0: i32) -> (i32, i32) {
    %c0_i32 = arith.constant 0 : i32
    %c0_i32_0 = arith.constant 0 : i32
    %c0_i32_1 = arith.constant 0 : i32
    return %c0_i32, %c0_i32_0 : i32, i32
  }
}

</mosaic_0001>

<bundles_post_ra>
// kernel: tpu_custom_call.1
= control target key start
LH: loop header
LB: loop body
LE: loop exit
PB: predicated region body
PF: predicated region fallthrough
CT: control target
= control target key end

     0   :  { %s5767_s0 = inlined_call_operand.hbm [shape: f32[16,32], index: 0, kind: input, shape index: {}]   ;;  %s5768_s1 = inlined_call_operand.hbm [shape: f32[16,32], index: 1, kind: input, shape index: {}]   ;;  %s5769_s2 = inlined_call_operand.vmem [shape: f32[32,96], index: 2, kind: input, shape index: {}]   ;;  %s5770_s3 = inlined_call_operand.vmem [shape: f32[1,96], index: 3, kind: input, shape index: {}]   ;;  %s5771_s4 = inlined_call_operand.vmem [shape: f32[32,32], index: 4, kind: input, shape index: {}]   ;;  %s5772_s5 = inlined_call_operand.vmem [shape: f32[1,32], index: 5, kind: input, shape index: {}]   ;;  %s5773_s6 = inlined_call_operand.vmem [shape: f32[32,32], index: 6, kind: input, shape index: {}]   ;;  %s5774_s7 = inlined_call_operand.vmem [shape: f32[1,32], index: 7, kind: input, shape index: {}]   ;;  %s5775_s8 = inlined_call_operand.hbm [shape: f32[32,64], index: 8, kind: input, shape index: {}]   ;;  %s5776_s9 = inlined_call_operand.vmem [shape: f32[1,64], index: 9, kind: input, shape index: {}]   ;;  %s5777_s10 = inlined_call_operand.hbm [shape: f32[32,32], index: 10, kind: input, shape index: {}]   ;;  %s5778_s11 = inlined_call_operand.vmem [shape: f32[1,32], index: 11, kind: input, shape index: {}]   ;;  %s5779_s12 = inlined_call_operand.vmem [shape: f32[6,32], index: 12, kind: input, shape index: {}]   ;;  %s5780_s13 = inlined_call_operand.hbm [shape: f32[32,64], index: 13, kind: input, shape index: {}]   ;;  %s5781_s14 = inlined_call_operand.vmem [shape: f32[1,64], index: 14, kind: input, shape index: {}]   ;;  %s5782_s15 = inlined_call_operand.vmem [shape: f32[64,32], index: 15, kind: input, shape index: {}]   ;;  %s5783_s16 = inlined_call_operand.vmem [shape: f32[1,32], index: 16, kind: input, shape index: {}]   ;;  %s5784_s17 = inlined_call_operand.hbm [shape: f32[16,32], index: 17, kind: output, shape index: {}]  }
   0x1   :  { %5792 = sst [smem:[#allocation19_spill]] %s5767_s0 }
   0x2   :  { %5793 = sst [smem:[#allocation20_spill]] %s5768_s1 }
   0x3   :  { %5794 = sst [smem:[#allocation21_spill]] %s5778_s11 }
   0x4   :  { %5795 = sst [smem:[#allocation22_spill]] %s5781_s14 }
   0x5   :  { %5796 = sst [smem:[#allocation23_spill]] %s5782_s15 }
   0x6   :  { %5797 = sst [smem:[#allocation24_spill]] %s5783_s16 }
   0x7   :  { %5798 = sst [smem:[#allocation25_spill]] %s5784_s17 }
   0x8   :  { %22 = vsyncpa [#allocation5], 0 }
   0x9   :  { %23 = vsyncpa [#allocation8], 0 }
   0xa   :  { %24 = vsyncpa [#allocation11], 0 }
   0xb   :  { %25 = vsyncpa [#allocation6], 0  ;;  %s5127_s24 = smov 0  }
   0xc LB: > { %5799 = sst [smem:[#allocation18_spill]] %s5016_s24  ;;  %s5133_s25 = sadd.s32 4294967295, %s5016_s24   ;;  %s5016_s24 = sphi %s5127_s24, %s31_s24  }
   0xd   : > { %p4168_p0 = scmp.ge.s32.totalorder %s5016_s24, 1  ;;  %p414_p1 = scmp.lt.s32.totalorder %s5016_s24, 3 }
   0xe   : > { %p5790_p3 = scmp.eq.s32.totalorder %s5133_s25, 0  ;;  %s5018_s27 = smov [#allocation7]  }
   0xf   : > { %p5139_p4 = pnand %p4168_p0, %p414_p1  ;;  %s439_s28 = sshll.u32 %s5018_s27, 4  ;;  %s5143_s28 = int_to_ptr.vmem [resolvable:$true] %s439_s28 }
  0x10   : > { %s5019_s29 = smov [#allocation10]   ;;  %s5020_s18 = smov [#allocation4]  }
  0x11   : > { %s5800_s26 = scalar_select %p5139_p4, 1, 0 }
  0x12   : > { %p4697_p5 = pneg %p5139_p4  ;;  %s486_s0 = sshll.u32 %s5019_s29, 4  ;;  %s5147_s0 = int_to_ptr.vmem [resolvable:$true] %s486_s0 }
  0x13   : > { %s426_s19 = sshll.u32 %s5020_s18, 4  ;;  %s5021_s1 = smov [#allocation9]   ;;  %s5155_s19 = int_to_ptr.vmem [resolvable:$true] %s426_s19 }
  0x14   : > { %p5151_p6 = pnand %p5790_p3, %p4697_p5  ;;  %s5157_s20 = sshll.u32 %s5021_s1, 4  ;;  %s471_s20 = int_to_ptr.vmem [resolvable:$true] %s5157_s20 }
  0x15   : > { %s5802_s23 = sld [smem:[#allocation20_spill]] }
  0x16   : > { %p5167_p8 = pneg %p5151_p6 }
  0x1b   : > { %s4828_s27 = scalar_lea.hbm %s5802_s23, 256 }
  0x1c   : > { %p4829_p7 = scmp.ne.s32.totalorder %s5802_s23, %s4828_s27  ;;  %p4835_p11 = scmp.lt.u32.totalorder %s4828_s27, %s5802_s23 }
  0x1e   : > { %p4831_p9 = pnand %p5167_p8, %p4829_p7 }
  0x20   : > { %p4832_p10 = pneg %p4831_p9 }
  0x22   : > { %p4837_p12 = pnand %p4835_p11, %p4832_p10 }
  0x24   : > { %4840 = shalt.err (!%p4837_p12)
}
  0x25   : > { %s4841_s24 = scalar_lea.vmem %s5143_s28, 256  ;;  %p4849_p5 = scmp.lt.s32.totalorder %s5143_s28, %s5143_s28 }
  0x26   : > { %p4842_p13 = scmp.ne.s32.totalorder %s5143_s28, %s4841_s24  ;;  %p4850_p2 = scmp.lt.s32.totalorder %s4841_s24, %s4841_s24 }
  0x28   : > { %p4844_p0 = pnand %p4842_p13, %p5167_p8  ;;  %p4851_p7 = por %p4850_p2, %p4849_p5 }
  0x2a   : > { %p4845_p1 = pneg %p4844_p0 }
  0x2c   : > { %p4852_p9 = pnand %p4851_p7, %p4845_p1 }
  0x2e   : > { %4855 = shalt.err (!%p4852_p9)
}
  0x2f   : > { %s5022_s21 = smov 128   ;;  %s5023_s22 = smov 8  }
  0x30   : > { %4703 = dma.hbm_to_vmem [thread:$0]  (!%p5151_p6), %s5802_s23, 256, %s5143_s28, [#allocation8], %s5022_s21, %s5022_s21, %s5023_s22  }
  0x31   : > { %s4856_s24 = scalar_lea.hbm %s5777_s10, 512 }
  0x32   : > { %p4857_p2 = scmp.ne.s32.totalorder %s5777_s10, %s4856_s24  ;;  %p4863_p12 = scmp.lt.u32.totalorder %s4856_s24, %s5777_s10 }
  0x34   : > { %p4859_p10 = pnand %p4857_p2, %p5167_p8 }
  0x36   : > { %p4860_p11 = pneg %p4859_p10 }
  0x38   : > { %p4865_p13 = pnand %p4863_p12, %p4860_p11 }
  0x3a   : > { %4868 = shalt.err (!%p4865_p13)
}
  0x3b   : > { %s4869_s28 = scalar_lea.vmem %s5147_s0, 512  ;;  %p4877_p7 = scmp.lt.s32.totalorder %s5147_s0, %s5147_s0 }
  0x3c   : > { %p4870_p0 = scmp.ne.s32.totalorder %s5147_s0, %s4869_s28  ;;  %p4878_p9 = scmp.lt.s32.totalorder %s4869_s28, %s4869_s28 }
  0x3e   : > { %p4872_p1 = pnand %p4870_p0, %p5167_p8  ;;  %p4879_p2 = por %p4878_p9, %p4877_p7 }
  0x40   : > { %p4873_p5 = pneg %p4872_p1 }
  0x42   : > { %p4880_p10 = pnand %p4879_p2, %p4873_p5 }
  0x44   : > { %4883 = shalt.err (!%p4880_p10)
}
  0x45   : > { %4709 = dma.hbm_to_vmem [thread:$0]  (!%p5151_p6), %s5777_s10, 512, %s5147_s0, [#allocation11], %s5022_s21, %s5022_s21, %s5023_s22  }
  0x46   : > { %s5804_s27 = sld [smem:[#allocation19_spill]] }
  0x4c   : > { %s4884_s29 = scalar_lea.hbm %s5804_s27, 256 }
  0x4d   : > { %p4885_p11 = scmp.ne.s32.totalorder %s5804_s27, %s4884_s29  ;;  %p4891_p0 = scmp.lt.u32.totalorder %s4884_s29, %s5804_s27 }
  0x4f   : > { %p4887_p12 = pnand %p4885_p11, %p5167_p8 }
  0x51   : > { %p4888_p13 = pneg %p4887_p12 }
  0x53   : > { %p4893_p1 = pnand %p4891_p0, %p4888_p13 }
  0x55   : > { %4896 = shalt.err (!%p4893_p1)
}
  0x56   : > { %s4897_s0 = scalar_lea.vmem %s5155_s19, 256  ;;  %p4905_p2 = scmp.lt.s32.totalorder %s5155_s19, %s5155_s19 }
  0x57   : > { %p4898_p5 = scmp.ne.s32.totalorder %s5155_s19, %s4897_s0  ;;  %p4906_p10 = scmp.lt.s32.totalorder %s4897_s0, %s4897_s0 }
  0x59   : > { %p4900_p7 = pnand %p4898_p5, %p5167_p8  ;;  %p4907_p11 = por %p4906_p10, %p4905_p2 }
  0x5b   : > { %p4901_p9 = pneg %p4900_p7 }
  0x5d   : > { %p4908_p12 = pnand %p4907_p11, %p4901_p9 }
  0x5f   : > { %4911 = shalt.err (!%p4908_p12)
}
  0x60   : > { %4700 = dma.hbm_to_vmem [thread:$0]  (!%p5151_p6), %s5804_s27, 256, %s5155_s19, [#allocation5], %s5022_s21, %s5022_s21, %s5023_s22  }
  0x61   : > { %s4912_s29 = scalar_lea.hbm %s5775_s8, 512 }
  0x62   : > { %p4913_p13 = scmp.ne.s32.totalorder %s5775_s8, %s4912_s29  ;;  %p4919_p5 = scmp.lt.u32.totalorder %s4912_s29, %s5775_s8 }
  0x64   : > { %p4915_p0 = pnand %p4913_p13, %p5167_p8 }
  0x66   : > { %p4916_p1 = pneg %p4915_p0 }
  0x68   : > { %p4921_p7 = pnand %p4919_p5, %p4916_p1 }
  0x6a   : > { %4924 = shalt.err (!%p4921_p7)
}
  0x6b   : > { %s4925_s0 = scalar_lea.vmem %s471_s20, 512  ;;  %p4933_p11 = scmp.lt.s32.totalorder %s471_s20, %s471_s20 }
  0x6c   : > { %p4926_p9 = scmp.ne.s32.totalorder %s471_s20, %s4925_s0  ;;  %p4934_p12 = scmp.lt.s32.totalorder %s4925_s0, %s4925_s0 }
  0x6e   : > { %p4928_p2 = pnand %p4926_p9, %p5167_p8  ;;  %p4935_p3 = por %p4934_p12, %p4933_p11 }
  0x70   : > { %p4929_p10 = pneg %p4928_p2 }
  0x72   : > { %p4936_p4 = pnand %p4935_p3, %p4929_p10 }
  0x74   : > { %4939 = shalt.err (!%p4936_p4)
}
  0x75   : > { %4706 = dma.hbm_to_vmem [thread:$0]  (!%p5151_p6), %s5775_s8, 512, %s471_s20, [#allocation8], %s5022_s21, %s5022_s21, %s5023_s22  }
  0x76   : > { %s5024_s14 = smov [#allocation12]   ;;  %s4940_s18 = scalar_lea.hbm %s5780_s13, 512 }
  0x77   : > { %s505_s15 = sshll.u32 %s5024_s14, 4  ;;  %p4941_p3 = scmp.ne.s32.totalorder %s5780_s13, %s4940_s18  ;;  %s506_s15 = int_to_ptr.vmem [resolvable:$true] %s505_s15 }
  0x78   : > { %p4947_p0 = scmp.lt.u32.totalorder %s4940_s18, %s5780_s13 }
  0x79   : > { %p4943_p4 = pnand %p4941_p3, %p5167_p8 }
  0x7b   : > { %p4944_p13 = pneg %p4943_p4 }
  0x7d   : > { %p4949_p1 = pnand %p4947_p0, %p4944_p13 }
  0x7f   : > { %4952 = shalt.err (!%p4949_p1)
}
  0x80   : > { %s4953_s20 = scalar_lea.vmem %s506_s15, 512  ;;  %p4961_p2 = scmp.lt.s32.totalorder %s506_s15, %s506_s15 }
  0x81   : > { %p4954_p5 = scmp.ne.s32.totalorder %s506_s15, %s4953_s20  ;;  %p4962_p10 = scmp.lt.s32.totalorder %s4953_s20, %s4953_s20 }
  0x83   : > { %p4956_p7 = pnand %p4954_p5, %p5167_p8  ;;  %p4963_p11 = por %p4962_p10, %p4961_p2 }
  0x85   : > { %p4957_p9 = pneg %p4956_p7 }
  0x87   : > { %p4964_p12 = pnand %p4963_p11, %p4957_p9 }
  0x89   : > { %4967 = shalt.err (!%p4964_p12)
}
  0x8a   : > { %4712 = dma.hbm_to_vmem [thread:$0]  (!%p5151_p6), %s5780_s13, 512, %s506_s15, [#allocation11], %s5022_s21, %s5022_s21, %s5023_s22  }
  0x8b   : > { %p5805_p3 = scmp.ne.s32.totalorder %s5800_s26, 0 }
  0x8c   : > { %p5806_p8 = scmp.eq.s32.totalorder (!%p5805_p3), %s5133_s25, 0 }
  0x8d   : > { %530 = sbr.rel (%p5805_p3) target bundleno = 5851 (0x16db), region = 88 }
  0x94   : > { %4999 = dma.done.wait (%p5806_p8), [#allocation5], 256   ;;  %p5807_p4 = pmov %p5806_p8 }
  0x96   : > { %5001 = vsyncadd (%p5807_p4), [#allocation5], 4294967040  ;;  %p5808_p13 = pmov %p5807_p4 }
  0x97   : > { %p5809_p0 = pmov %p5807_p4 }
  0x98   : > { %5003 = dma.done.wait (%p5808_p13), [#allocation8], 768  }
  0x99   : > { %5005 = vsyncadd (%p5809_p0), [#allocation8], 4294966528  ;;  %p5810_p1 = pmov %p5809_p0 }
  0x9a   : > { %p5811_p6 = pmov %p5809_p0 }
  0x9b   : > { %5007 = dma.done.wait (%p5810_p1), [#allocation11], 1024  }
  0x9c   : > { %5009 = vsyncadd (%p5811_p6), [#allocation11], 4294966272  ;;  %p5812_p5 = scmp.ne.s32.totalorder %s5133_s25, 0 }
  0x9d   : > { %v599_v0 = vld [vmem:[#allocation9] sm:$0xff] (!%p5812_p5)  ;;  %v600_v1 = vld [vmem:[#allocation9 + $0x8] sm:$0xff] (!%p5812_p5)  ;;  %v601_v2 = vld [vmem:[#allocation9 + $0x10] sm:$0xff] (!%p5812_p5)  ;;  %vm594_vm0 = vcmask (!%p5812_p5), 261120   ;;  %vm691_vm1 = vcmask (!%p5812_p5), 523264  }
  0x9e   : > { %591 = sbr.rel (%p5812_p5) target bundleno = 384 (0x180), region = 112  ;;  %v4609_v3 = vpack.c.bf16 (!%p5812_p5), %v600_v1, %v599_v0  ;;  %v602_v4 = vld [vmem:[#allocation9 + $0x18] sm:$0xff] (!%p5812_p5)  ;;  %v592_v5 = vld [vmem:[#allocation4] sm:$0xff] (!%p5812_p5)  ;;  %v593_v6 = vld [vmem:[#allocation4 + $0x8] sm:$0xff] (!%p5812_p5) }
  0x9f   : > { %v4613_v7 = vpack.c.bf16 (!%p5812_p5), %v602_v4, %v601_v2  ;;  %595 = vst.msk [vmem:[#allocation2] sm:$0xff] (!%p5812_p5), %vm594_vm0, %v592_v5  ;;  %596 = vst.msk [vmem:[#allocation2 + $0x8] sm:$0xff] (!%p5812_p5), %vm594_vm0, %v593_v6  ;;  %v597_v8 = vld [vmem:[#allocation7] sm:$0xff] (!%p5812_p5)  ;;  %v598_v9 = vld [vmem:[#allocation7 + $0x8] sm:$0xff] (!%p5812_p5) }
  0xa0   : > { %4610 = vmatprep.subr.bf16.mxu0 (!%p5812_p5), %v4609_v3  ;;  %4372 = vmatprep.mubr.msk.f32.mxu0 (!%p5812_p5), %vm594_vm0, %v597_v8  ;;  %v4181_v10 = vld [vmem:[%s5776_s9] ss:$0 sm:$0xff] (!%p5812_p5) }
  0xa1   : > { %4612 = vmatpush3.bf16.msra.mxu0 (!%p5812_p5), %v4609_v3 }
  0xa2   : > { %4614 = vmatprep.subr.bf16.mxu0 (!%p5812_p5), %v4613_v7 }
  0xa5   : > { %4616 = vmatpush3.bf16.msra.mxu0 %v4613_v7 }
  0xa8   : > { %4373 = vmatmul.mubr.msk.f32.vlgmr.msra.gmra.mrb[0].mxu0 %vm594_vm0, %v598_v9 }
 0x17b   : > { %v4374_v11 = vpop.f32.mrb[0].mxu0 }
 0x17c   : > { %v688_v12 = vadd.f32 %v4374_v11, %v4181_v10  ;;  %v682_v13 = vpop.f32.mrb[1].mxu0 }
 0x17d   : > { %v683_v14 = vadd.f32 %v4181_v10, %v682_v13 }
 0x17e   : > { %693 = vst.msk [vmem:[#allocation3 + $0x8] sm:$0xff] %vm691_vm1, %v688_v12 }
 0x17f   : > { %692 = vst.msk [vmem:[#allocation3] sm:$0xff] %vm691_vm1, %v683_v14 }
 0x180 PF: > { %v697_v15 = vld [vmem:[%s5769_s2] sm:$0xff]  ;;  %v698_v16 = vld [vmem:[%s5769_s2 + $0x8] sm:$0xff]  ;;  %v699_v17 = vld [vmem:[%s5769_s2 + $0x10] sm:$0xff]  ;;  %vm708_vm2 = vcmask 261120   ;;  %v5025_v23 = vmov 0.0   ;;  %vm5026_vm3 = vmmov 0  }
 0x181   : > { %v4617_v18 = vpack.c.bf16 %v698_v16, %v697_v15  ;;  %v700_v19 = vld [vmem:[%s5769_s2 + $0x18] sm:$0xff]  ;;  %v5317_v20 = vld [vmem:[#allocation2] sm:$0xff]  ;;  %v5321_v22 = vld [vmem:[#allocation2 + $0x8] sm:$0xff]  ;;  %4396 = vmatprep.subr.mxu0 %v5025_v23  ;;  %4398 = vmatprep.mubr.msk.f32.mxu0 %vm5026_vm3, %v5025_v23  ;;  %s5027_s28 = smov 104   ;;  %s5028_s0 = smov 120   ;;  %vm799_vm4 = vcmask 64512  }
 0x182   : > { %v4621_v21 = vpack.c.bf16 %v700_v19, %v699_v17  ;;  %4383 = vmatprep.mubr.msk.f32.mxu1 %vm708_vm2, %v5317_v20  ;;  %v4184_v24 = vld [vmem:[%s5770_s3] ss:$0 sm:$0xff]  ;;  %s5029_s20 = smov 96   ;;  %s5030_s19 = smov 112   ;;  %vm1463_vm5 = vcmask 130048   ;;  %vm1465_vm6 = vcmask 195584  }
 0x183   : > { %4618 = vmatprep.subr.bf16.mxu1 %v4617_v18  ;;  %s5031_s11 = smov 64   ;;  %s5032_s17 = smov 16   ;;  %vm3955_vm7 = vcmask 523264  }
 0x184   : > { %4620 = vmatpush3.bf16.msra.mxu1 %v4617_v18  ;;  %s5033_s26 = smov 24   ;;  %s5034_s30 = smov 8  }
 0x185   : > { %4622 = vmatprep.subr.bf16.mxu1 %v4621_v21  ;;  %s5815_s15 = sld [smem:[#allocation22_spill]]  ;;  %s5816_s18 = sld [smem:[#allocation24_spill]] }
 0x186   : > { %s5035_s1 = smov [#allocation13]   ;;  %p4723_p7 = scmp.eq.s32.totalorder %s5133_s25, 1 }
 0x187   : > { %s4087_s24 = sshll.u32 %s5035_s1, 4  ;;  %s4088_s24 = int_to_ptr.vmem [resolvable:$true] %s4087_s24 }
 0x188   : > { %4624 = vmatpush3.bf16.msra.mxu1 %v4621_v21  ;;  %p4975_p11 = scmp.lt.s32.totalorder %s4088_s24, %s4088_s24 }
 0x189   : > { %4386 = vmatprep.subr.mxu1 %v5025_v23 }
 0x18b   : > { %4384 = vmatmul.mubr.msk.f32.vlgmr.msra.gmra.mrb[0].mxu1 %vm708_vm2, %v5321_v22 }
 0x18c   : > { %4388 = vmatprep.mubr.msk.f32.mxu1 %vm5026_vm3, %v5025_v23 }
 0x25e   : > { %v4385_v25 = vpop.f32.mrb[0].mxu1 }
 0x25f   : > { %v5334_v26 = vadd.f32 %v4385_v25, %v4184_v24  ;;  %v781_v27 = vpop.f32.mrb[1].mxu1 }
 0x260   : > { %v782_v28 = vadd.f32 %v4184_v24, %v781_v27 }
 0x262   : > { %795 = vrot.lane.b32.xlu1 %v782_v28, %s5027_s28  ;;  %791 = vrot.lane.b32.xlu0 %v782_v28, %s5028_s0 }
 0x266   : > { %797 = vrot.lane.b32.xlu1 %v782_v28, %s5029_s20  ;;  %793 = vrot.lane.b32.xlu0 %v782_v28, %s5030_s19 }
 0x2d4   : > { %v796_v29 = vpop.permute.xlu1 %795  ;;  %v792_v30 = vpop.permute.xlu0 %791 }
 0x2d5   : > { %874 = vrot.lane.b32.xlu0 %v792_v30, %s5029_s20 }
 0x2d8   : > { %v798_v31 = vpop.permute.xlu1 %797  ;;  %v794_v32 = vpop.permute.xlu0 %793 }
 0x2d9   : > { %4387 = vmatpush3.xpose.msk.msra.mxu1 %vm799_vm4, %v798_v31  ;;  %1026 = vrot.lane.b32.xlu0 %v796_v29, %s5029_s20 }
 0x2da   : > { %950 = vrot.lane.b32.xlu1 %v794_v32, %s5029_s20  ;;  %4391 = vmatprep.subr.mxu1 %v5025_v23 }
 0x2dc   : > { %4389 = vmatmul.mubr.msk.f32.vlgmr.msra.gmra.mrb[2].mxu1 %vm799_vm4, %v782_v28 }
 0x2dd   : > { %4393 = vmatprep.mubr.msk.f32.mxu1 %vm5026_vm3, %v5025_v23 }
 0x347   : > { %v875_v33 = vpop.permute.xlu0 %874 }
 0x348   : > { %4392 = vmatpush3.xpose.msk.msra.mxu1 %vm799_vm4, %v875_v33 }
 0x349   : > { %4401 = vmatprep.subr.mxu1 %v5025_v23 }
 0x34b   : > { %4394 = vmatmul.mubr.msk.f32.vlgmr.msra.gmra.mrb[4].mxu1 %vm799_vm4, %v792_v30  ;;  %v1027_v34 = vpop.permute.xlu0 %1026 }
 0x34c   : > { %v951_v35 = vpop.permute.xlu1 %950  ;;  %4402 = vmatpush3.xpose.msk.msra.mxu1 %vm799_vm4, %v1027_v34  ;;  %4403 = vmatprep.mubr.msk.f32.mxu1 %vm5026_vm3, %v5025_v23 }
 0x34d   : > { %4397 = vmatpush3.xpose.msk.msra.mxu0 %vm799_vm4, %v951_v35  ;;  %4411 = vmatprep.subr.mxu1 %v5025_v23 }
 0x34e   : > { %4406 = vmatprep.subr.mxu0 %v5025_v23 }
 0x34f   : > { %4404 = vmatmul.mubr.msk.f32.vlgmr.msra.gmra.mrb[6].mxu1 %vm799_vm4, %v796_v29 }
 0x350   : > { %4399 = vmatmul.mubr.msk.f32.vlgmr.msra.gmra.mrb[0].mxu0 %vm799_vm4, %v794_v32  ;;  %4413 = vmatprep.mubr.msk.f32.mxu1 %vm5026_vm3, %v5025_v23 }
 0x351   : > { %4408 = vmatprep.mubr.msk.f32.mxu0 %vm5026_vm3, %v5025_v23 }
 0x3af   : > { %v870_v36 = vpop.f32.mrb[2].mxu1 }
 0x3b0   : > { %v4390_v37 = vpop.f32.mrb[3].mxu1  ;;  %v1102_v38 = vsel %vm799_vm4, %v870_v36, -inf }
 0x3b1   : > { %1103 = vmax.xlane.f32.xlu1 %v1102_v38 }
 0x41e   : > { %v946_v39 = vpop.f32.mrb[4].mxu1 }
 0x41f   : > { %v4395_v40 = vpop.f32.mrb[5].mxu1  ;;  %v1105_v41 = vsel %vm799_vm4, %v946_v39, -inf }
 0x420   : > { %1106 = vmax.xlane.f32.xlu0 %v1105_v41 }
 0x422   : > { %v1098_v42 = vpop.f32.mrb[6].mxu1 }
 0x423   : > { %v1022_v43 = vpop.f32.mrb[0].mxu0  ;;  %v4405_v44 = vpop.f32.mrb[7].mxu1  ;;  %v1111_v45 = vsel %vm799_vm4, %v1098_v42, -inf }
 0x424   : > { %v4400_v46 = vpop.f32.mrb[1].mxu0  ;;  %v1108_v47 = vsel %vm799_vm4, %v1022_v43, -inf  ;;  %1112 = vmax.xlane.f32.xlu1 %v1111_v45 }
 0x425   : > { %1109 = vmax.xlane.f32.xlu0 %v1108_v47 }
 0x435   : > { %1470 = vrot.lane.b32.xlu1 %v5334_v26, %s5030_s19 }
 0x439   : > { %1472 = vrot.lane.b32.xlu1 %v5334_v26, %s5027_s28 }
 0x43b   : > { %1468 = vrot.lane.b32.xlu0 %v5334_v26, %s5028_s0 }
 0x43d   : > { %1146 = vrot.lane.b32.xlu1 %v782_v28, %s5031_s11 }
 0x43e   : > { %v1104_v48 = vpop.xlane.xlu1 %1103 }
 0x43f   : > { %1222 = vrot.lane.b32.xlu0 %v792_v30, %s5031_s11  ;;  %v1114_v49 = vsub.f32 %v870_v36, %v1104_v48 }
 0x441   : > { %1298 = vrot.lane.b32.xlu1 %v794_v32, %s5031_s11  ;;  %v1118_v50 = vmul.f32 1.442695, %v1114_v49 }
 0x443   : > { %1474 = vrot.lane.b32.xlu0 %v5334_v26, %s5029_s20  ;;  %4752 = vpow2.f32 %v1118_v50 }
 0x445   : > { %1374 = vrot.lane.b32.xlu1 %v796_v29, %s5031_s11 }
 0x44d   : > { %v4753_v51 = vpop.eup %4752 }
 0x44e   : > { %v1126_v52 = vsel %vm799_vm4, %v4753_v51, 0.0 }
 0x462   : > { %1127 = vadd.xlane.f32.xlu0 %v1126_v52 }
 0x4ad   : > { %v1107_v53 = vpop.xlane.xlu0 %1106 }
 0x4ae   : > { %v1115_v54 = vsub.f32 %v946_v39, %v1107_v53 }
 0x4b0   : > { %v1120_v55 = vmul.f32 1.442695, %v1115_v54 }
 0x4b1   : > { %v1113_v56 = vpop.xlane.xlu1 %1112 }
 0x4b2   : > { %4754 = vpow2.f32 %v1120_v55  ;;  %v1117_v57 = vsub.f32 %v1098_v42, %v1113_v56  ;;  %v1110_v58 = vpop.xlane.xlu0 %1109 }
 0x4b3   : > { %v1116_v59 = vsub.f32 %v1022_v43, %v1110_v58 }
 0x4b4   : > { %v1124_v60 = vmul.f32 1.442695, %v1117_v57 }
 0x4b5   : > { %v1122_v61 = vmul.f32 1.442695, %v1116_v59  ;;  %v5380_v62 = vpop.permute.xlu1 %1470 }
 0x4b6   : > { %v5382_v63 = vpop.permute.xlu0 %1468 }
 0x4b7   : > { %4756 = vpow2.f32 %v1122_v61 }
 0x4b8   : > { %4758 = vpow2.f32 %v1124_v60 }
 0x4b9   : > { %v5384_v0 = vpop.permute.xlu1 %1472 }
 0x4ba   : > { %v1223_v1 = vpop.permute.xlu0 %1222 }
 0x4bb   : > { %4412 = vmatpush3.msra.mxu1 %v1223_v1 }
 0x4bc   : > { %v4755_v2 = vpop.eup %4754  ;;  %4421 = vmatprep.subr.mxu1 %v5025_v23 }
 0x4bd   : > { %v1147_v3 = vpop.permute.xlu1 %1146  ;;  %v1129_v4 = vsel %vm799_vm4, %v4755_v2, 0.0 }
 0x4be   : > { %4407 = vmatpush3.msra.mxu0 %v1147_v3  ;;  %1130 = vadd.xlane.f32.xlu1 %v1129_v4  ;;  %v1475_v9 = vpop.permute.xlu0 %1474 }
 0x4bf   : > { %4416 = vmatprep.subr.mxu0 %v5025_v23 }
 0x4c1   : > { %v4757_v5 = vpop.eup %4756  ;;  %v1299_v13 = vpop.permute.xlu1 %1298 }
 0x4c2   : > { %v1132_v6 = vsel %vm799_vm4, %v4757_v5, 0.0  ;;  %v4759_v7 = vpop.eup %4758 }
 0x4c3   : > { %1133 = vadd.xlane.f32.xlu0 %v1132_v6  ;;  %v1135_v8 = vsel %vm799_vm4, %v4759_v7, 0.0 }
 0x4c5   : > { %v1375_v14 = vpop.permute.xlu1 %1374 }
 0x4c7   : > { %1136 = vadd.xlane.f32.xlu0 %v1135_v8 }
 0x4cf   : > { %1550 = vrot.lane.b32.xlu1 %v5382_v63, %s5029_s20 }
 0x4d3   : > { %1702 = vrot.lane.b32.xlu1 %v5384_v0, %s5029_s20 }
 0x4dd   : > { %1626 = vrot.lane.b32.xlu0 %v5380_v62, %s5029_s20 }
 0x4ef   : > { %v1128_v10 = vpop.xlane.xlu0 %1127 }
 0x4f0   : > { %4760 = vrcp.f32 %v1128_v10 }
 0x4fa   : > { %v4761_v11 = vpop.eup %4760 }
 0x4fb   : > { %v1142_v12 = vmul.f32 %v4761_v11, %v4753_v51 }
 0x4fd   : > { %4409 = vmatmul.mubr.msk.f32.vlgmr.msra.gmra.mrb[2].mxu0 %vm799_vm4, %v1142_v12 }
 0x4fe   : > { %4417 = vmatpush3.msra.mxu0 %v1299_v13  ;;  %4418 = vmatprep.mubr.msk.f32.mxu0 %vm5026_vm3, %v5025_v23 }
 0x4ff   : > { %4426 = vmatprep.subr.mxu0 %v5025_v23 }
 0x54b   : > { %v1131_v15 = vpop.xlane.xlu1 %1130 }
 0x54c   : > { %4762 = vrcp.f32 %v1131_v15 }
 0x54f   : > { %v1551_v27 = vpop.permute.xlu1 %1550 }
 0x550   : > { %v1134_v16 = vpop.xlane.xlu0 %1133 }
 0x551   : > { %4764 = vrcp.f32 %v1134_v16 }
 0x553   : > { %v1703_v30 = vpop.permute.xlu1 %1702 }
 0x554   : > { %v1137_v17 = vpop.xlane.xlu0 %1136 }
 0x555   : > { %4766 = vrcp.f32 %v1137_v17 }
 0x556   : > { %v4763_v18 = vpop.eup %4762 }
 0x557   : > { %v1143_v19 = vmul.f32 %v4763_v18, %v4755_v2 }
 0x558   : > { %v1627_v29 = vpop.permute.xlu0 %1626 }
 0x559   : > { %4414 = vmatmul.mubr.msk.f32.vlgmr.msra.gmra.mrb[8].mxu1 %vm799_vm4, %v1143_v19 }
 0x55a   : > { %4422 = vmatpush3.msra.mxu1 %v1375_v14  ;;  %4423 = vmatprep.mubr.msk.f32.mxu1 %vm5026_vm3, %v5025_v23 }
 0x55b   : > { %v4765_v21 = vpop.eup %4764  ;;  %4431 = vmatprep.subr.mxu1 %v5025_v23 }
 0x55c   : > { %v1144_v24 = vmul.f32 %v4765_v21, %v4757_v5 }
 0x55e   : > { %4419 = vmatmul.mubr.msk.f32.vlgmr.msra.gmra.mrb[4].mxu0 %vm799_vm4, %v1144_v24 }
 0x55f   : > { %v4767_v25 = vpop.eup %4766  ;;  %4427 = vmatpush3.xpose.msk.msra.mxu0 %vm799_vm4, %v1475_v9  ;;  %4428 = vmatprep.mubr.msk.f32.mxu0 %vm5026_vm3, %v5025_v23 }
 0x560   : > { %v1145_v28 = vmul.f32 %v4767_v25, %v4759_v7  ;;  %4436 = vmatprep.subr.mxu0 %v5025_v23 }
 0x562   : > { %4424 = vmatmul.mubr.msk.f32.vlgmr.msra.gmra.mrb[10].mxu1 %vm799_vm4, %v1145_v28  ;;  %4429 = vmatmul.mubr.msk.f32.vlgmr.msra.gmra.mrb[6].mxu0 %vm799_vm4, %v5334_v26 }
 0x563   : > { %4432 = vmatpush3.xpose.msk.msra.mxu1 %vm799_vm4, %v1551_v27  ;;  %4437 = vmatpush3.xpose.msk.msra.mxu0 %vm799_vm4, %v1627_v29 }
 0x564   : > { %4433 = vmatprep.mubr.msk.f32.mxu1 %vm5026_vm3, %v5025_v23  ;;  %4438 = vmatprep.mubr.msk.f32.mxu0 %vm5026_vm3, %v5025_v23 }
 0x565   : > { %4441 = vmatprep.subr.mxu1 %v5025_v23  ;;  %4446 = vmatprep.subr.mxu0 %v5025_v23 }
 0x566   : > { %4434 = vmatmul.mubr.msk.f32.vlgmr.msra.gmra.mrb[12].mxu1 %vm799_vm4, %v5382_v63  ;;  %4439 = vmatmul.mubr.msk.f32.vlgmr.msra.gmra.mrb[8].mxu0 %vm799_vm4, %v5380_v62 }
 0x567   : > { %4442 = vmatpush3.xpose.msk.msra.mxu1 %vm799_vm4, %v1703_v30  ;;  %4443 = vmatprep.mubr.msk.f32.mxu1 %vm5026_vm3, %v5025_v23 }
 0x568   : > { %4451 = vmatprep.subr.mxu1 %v5025_v23  ;;  %4448 = vmatprep.mubr.msk.f32.mxu0 %vm5026_vm3, %v5025_v23 }
 0x56a   : > { %4444 = vmatmul.mubr.msk.f32.vlgmr.msra.gmra.mrb[14].mxu1 %vm799_vm4, %v5384_v0 }
 0x56b   : > { %4453 = vmatprep.mubr.msk.f32.mxu1 %vm5026_vm3, %v5025_v23 }
 0x5d0   : > { %v5435_v31 = vpop.f32.mrb[2].mxu0 }
 0x5d1   : > { %v4410_v32 = vpop.f32.mrb[3].mxu0 }
 0x62c   : > { %v1294_v33 = vpop.f32.mrb[8].mxu1 }
 0x62d   : > { %v4415_v34 = vpop.f32.mrb[9].mxu1 }
 0x631   : > { %v1370_v35 = vpop.f32.mrb[4].mxu0 }
 0x632   : > { %v4420_v36 = vpop.f32.mrb[5].mxu0 }
 0x633   : > { %v2144_v36 = vld [vmem:[%s5771_s4 + $0x18] sm:$0xff] }
 0x635   : > { %v1446_v37 = vpop.f32.mrb[10].mxu1  ;;  %v1546_v38 = vpop.f32.mrb[6].mxu0 }
 0x636   : > { %v4425_v39 = vpop.f32.mrb[11].mxu1  ;;  %v4430_v40 = vpop.f32.mrb[7].mxu0  ;;  %v1778_v41 = vsel %vm799_vm4, %v1546_v38, -inf }
 0x637   : > { %1779 = vmax.xlane.f32.xlu0 %v1778_v41 }
 0x639   : > { %v1622_v42 = vpop.f32.mrb[12].mxu1  ;;  %v1698_v43 = vpop.f32.mrb[8].mxu0 }
 0x63a   : > { %v4435_v44 = vpop.f32.mrb[13].mxu1  ;;  %v4440_v45 = vpop.f32.mrb[9].mxu0  ;;  %v1781_v46 = vsel %vm799_vm4, %v1622_v42, -inf  ;;  %v1784_v47 = vsel %vm799_vm4, %v1698_v43, -inf }
 0x63b   : > { %1782 = vmax.xlane.f32.xlu1 %v1781_v46  ;;  %1785 = vmax.xlane.f32.xlu0 %v1784_v47 }
 0x63d   : > { %v1774_v48 = vpop.f32.mrb[14].mxu1 }
 0x63e   : > { %v4445_v49 = vpop.f32.mrb[15].mxu1  ;;  %v1787_v50 = vsel %vm799_vm4, %v1774_v48, -inf }
 0x63f   : > { %1788 = vmax.xlane.f32.xlu0 %v1787_v50 }
 0x64c   : > { %1822 = vrot.lane.b32.xlu1 %v5334_v26, %s5031_s11 }
 0x6c4   : > { %v1780_v51 = vpop.xlane.xlu0 %1779 }
 0x6c5   : > { %v1790_v52 = vsub.f32 %v1546_v38, %v1780_v51 }
 0x6c7   : > { %v1794_v53 = vmul.f32 1.442695, %v1790_v52  ;;  %v4211_v52 = vld [vmem:[%s5772_s5] ss:$0 sm:$0xff] }
 0x6c8   : > { %v1783_v54 = vpop.xlane.xlu1 %1782  ;;  %v1786_v55 = vpop.xlane.xlu0 %1785 }
 0x6c9   : > { %4768 = vpow2.f32 %v1794_v53  ;;  %v1791_v56 = vsub.f32 %v1622_v42, %v1783_v54  ;;  %v1792_v57 = vsub.f32 %v1698_v43, %v1786_v55 }
 0x6cb   : > { %v1796_v58 = vmul.f32 1.442695, %v1791_v56  ;;  %v1798_v59 = vmul.f32 1.442695, %v1792_v57 }
 0x6cc   : > { %v1823_v60 = vpop.permute.xlu1 %1822  ;;  %v1789_v61 = vpop.xlane.xlu0 %1788 }
 0x6cd   : > { %4770 = vpow2.f32 %v1796_v58  ;;  %v1793_v1 = vsub.f32 %v1774_v48, %v1789_v61  ;;  %4447 = vmatpush3.msra.mxu0 %v1823_v60 }
 0x6ce   : > { %4772 = vpow2.f32 %v1798_v59  ;;  %4456 = vmatprep.subr.mxu0 %v5025_v23 }
 0x6cf   : > { %v1800_v2 = vmul.f32 1.442695, %v1793_v1 }
 0x6d1   : > { %4774 = vpow2.f32 %v1800_v2 }
 0x6d3   : > { %v4769_v26 = vpop.eup %4768 }
 0x6d4   : > { %v1802_v3 = vsel %vm799_vm4, %v4769_v26, 0.0 }
 0x6d5   : > { %1803 = vadd.xlane.f32.xlu1 %v1802_v3 }
 0x6d7   : > { %v4771_v4 = vpop.eup %4770 }
 0x6d8   : > { %v4773_v5 = vpop.eup %4772  ;;  %v1805_v6 = vsel %vm799_vm4, %v4771_v4, 0.0 }
 0x6d9   : > { %1806 = vadd.xlane.f32.xlu0 %v1805_v6  ;;  %v1808_v7 = vsel %vm799_vm4, %v4773_v5, 0.0 }
 0x6da   : > { %1809 = vadd.xlane.f32.xlu1 %v1808_v7 }
 0x6db   : > { %v4775_v8 = vpop.eup %4774 }
 0x6dc   : > { %v1811_v9 = vsel %vm799_vm4, %v4775_v8, 0.0 }
 0x6dd   : > { %1812 = vadd.xlane.f32.xlu0 %v1811_v9 }
 0x6eb   : > { %1974 = vrot.lane.b32.xlu1 %v5380_v62, %s5031_s11 }
 0x6ef   : > { %2050 = vrot.lane.b32.xlu1 %v5384_v0, %s5031_s11 }
 0x6f3   : > { %1455 = vrot.lane.b32.xlu1 %v1370_v35, %s5032_s17  ;;  %1898 = vrot.lane.b32.xlu0 %v5382_v63, %s5031_s11  ;;  %v2143_v35 = vld [vmem:[%s5771_s4 + $0x10] sm:$0xff]  ;;  %s4968_s11 = scalar_lea.vmem %s4088_s24, 256 }
 0x6f4   : > { %p4969_p9 = scmp.ne.s32.totalorder %s4088_s24, %s4968_s11  ;;  %p4976_p12 = scmp.lt.s32.totalorder %s4968_s11, %s4968_s11 }
 0x6f6   : > { %p4970_p2 = pnand %p4969_p9, %p4723_p7  ;;  %p4977_p3 = por %p4976_p12, %p4975_p11 }
 0x6f7   : > { %1459 = vrot.lane.b32.xlu1 %v1446_v37, %s5033_s26  ;;  %1451 = vrot.lane.b32.xlu0 %v1294_v33, %s5034_s30  ;;  %v2142_v33 = vld [vmem:[%s5771_s4 + $0x8] sm:$0xff]  ;;  %v4629_v37 = vpack.c.bf16 %v2144_v36, %v2143_v35 }
 0x6f8   : > { %p4971_p10 = pneg %p4970_p2 }
 0x6fa   : > { %p4978_p8 = pnand %p4977_p3, %p4971_p10 }
 0x762   : > { %v1804_v10 = vpop.xlane.xlu1 %1803 }
 0x763   : > { %4776 = vrcp.f32 %v1804_v10  ;;  %v2276_v10 = vld [vmem:[%s5773_s6 + $0x10] sm:$0xff] }
 0x766   : > { %v1807_v11 = vpop.xlane.xlu0 %1806 }
 0x767   : > { %v1810_v12 = vpop.xlane.xlu1 %1809  ;;  %4778 = vrcp.f32 %v1807_v11  ;;  %v2277_v11 = vld [vmem:[%s5773_s6 + $0x18] sm:$0xff] }
 0x768   : > { %4780 = vrcp.f32 %v1810_v12  ;;  %v4637_v12 = vpack.c.bf16 %v2277_v11, %v2276_v10 }
 0x76a   : > { %v1813_v62 = vpop.xlane.xlu0 %1812 }
 0x76b   : > { %v1975_v0 = vpop.permute.xlu1 %1974  ;;  %4782 = vrcp.f32 %v1813_v62  ;;  %v2366_v62 = vld [vmem:[#allocation3] sm:$0xff] }
 0x76d   : > { %v4777_v13 = vpop.eup %4776 }
 0x76e   : > { %v1818_v14 = vmul.f32 %v4777_v13, %v4769_v26  ;;  %v1899_v15 = vpop.permute.xlu0 %1898 }
 0x76f   : > { %v2051_v16 = vpop.permute.xlu1 %2050  ;;  %4452 = vmatpush3.msra.mxu1 %v1899_v15 }
 0x770   : > { %4449 = vmatmul.mubr.msk.f32.vlgmr.msra.gmra.mrb[10].mxu0 %vm799_vm4, %v1818_v14  ;;  %4461 = vmatprep.subr.mxu1 %v5025_v23  ;;  %v2262_v14 = vlaneseq }
 0x771   : > { %v4779_v63 = vpop.eup %4778  ;;  %4457 = vmatpush3.msra.mxu0 %v1975_v0  ;;  %4458 = vmatprep.mubr.msk.f32.mxu0 %vm5026_vm3, %v5025_v23 }
 0x772   : > { %v4781_v17 = vpop.eup %4780  ;;  %v1819_v18 = vmul.f32 %v4779_v63, %v4771_v4  ;;  %v1452_v19 = vpop.permute.xlu0 %1451 }
 0x773   : > { %v1820_v21 = vmul.f32 %v4781_v17, %v4773_v5  ;;  %v1456_v24 = vpop.permute.xlu1 %1455  ;;  %v1462_v25 = vsel %vm799_vm4, %v5435_v31, %v1452_v19  ;;  %v2141_v31 = vld [vmem:[%s5771_s4] sm:$0xff]  ;;  %v5520_v17 = vshrl.u32 %v2262_v14, 7 }
 0x774   : > { %4454 = vmatmul.mubr.msk.f32.vlgmr.msra.gmra.mrb[16].mxu1 %vm799_vm4, %v1819_v18  ;;  %v1464_v30 = vsel %vm1463_vm5, %v1462_v25, %v1456_v24  ;;  %v4625_v34 = vpack.c.bf16 %v2142_v33, %v2141_v31 }
 0x775   : > { %v4783_v27 = vpop.eup %4782  ;;  %4459 = vmatmul.mubr.msk.f32.vlgmr.msra.gmra.mrb[12].mxu0 %vm799_vm4, %v1820_v21  ;;  %4462 = vmatpush3.msra.mxu1 %v2051_v16  ;;  %v2264_v19 = vsub.s32 0, %v5520_v17  ;;  %v5526_v21 = vld [vmem:[%s5779_s12] sm:$0x3f]  ;;  %v2270_v24 = vsub.s32 1, %v5520_v17 }
 0x776   : > { %v1821_v28 = vmul.f32 %v4783_v27, %v4775_v8  ;;  %4463 = vmatprep.mubr.msk.f32.mxu1 %vm5026_vm3, %v5025_v23  ;;  %4626 = vmatprep.subr.bf16.mxu0 %v4625_v34  ;;  %v2275_v8 = vld [vmem:[%s5773_s6 + $0x8] sm:$0xff] }
 0x777   : > { %v1460_v29 = vpop.permute.xlu1 %1459  ;;  %4628 = vmatpush3.bf16.msra.mxu0 %v4625_v34  ;;  %v2265_v25 = vrot.slane %v5526_v21, %v2264_v19 }
 0x778   : > { %v1466_v32 = vsel %vm1465_vm6, %v1464_v30, %v1460_v29  ;;  %4464 = vmatmul.mubr.msk.f32.vlgmr.msra.gmra.mrb[18].mxu1 %vm799_vm4, %v1821_v28  ;;  %4630 = vmatprep.subr.bf16.mxu0 %v4629_v37  ;;  %v2271_v29 = vrot.slane %v5526_v21, %v2270_v24 }
 0x779   : > { %4474 = vmatprep.mubr.msk.f32.mxu0 %vm708_vm2, %v1466_v32 }
 0x77b   : > { %4632 = vmatpush3.bf16.msra.mxu0 %v4629_v37  ;;  %v4214_v37 = vld [vmem:[%s5774_s7] ss:$0 sm:$0xff] }
 0x77c   : > { %4488 = vmatprep.subr.mxu0 %v5025_v23 }
 0x843   : > { %v1894_v38 = vpop.f32.mrb[10].mxu0 }
 0x844   : > { %v4450_v39 = vpop.f32.mrb[11].mxu0 }
 0x847   : > { %v1970_v40 = vpop.f32.mrb[16].mxu1 }
 0x848   : > { %v2046_v41 = vpop.f32.mrb[12].mxu0  ;;  %2127 = vrot.lane.b32.xlu0 %v1970_v40, %s5034_s30  ;;  %v4455_v42 = vpop.f32.mrb[17].mxu1 }
 0x849   : > { %v4460_v43 = vpop.f32.mrb[13].mxu0 }
 0x84b   : > { %v2122_v44 = vpop.f32.mrb[18].mxu1 }
 0x84c   : > { %2131 = vrot.lane.b32.xlu0 %v2046_v41, %s5032_s17  ;;  %2135 = vrot.lane.b32.xlu1 %v2122_v44, %s5033_s26  ;;  %v4465_v45 = vpop.f32.mrb[19].mxu1 }
 0x8ba   : > { %v2128_v46 = vpop.permute.xlu0 %2127 }
 0x8bb   : > { %v2138_v47 = vsel %vm799_vm4, %v1894_v38, %v2128_v46 }
 0x8be   : > { %v2136_v48 = vpop.permute.xlu1 %2135  ;;  %v2132_v49 = vpop.permute.xlu0 %2131 }
 0x8bf   : > { %v2139_v50 = vsel %vm1463_vm5, %v2138_v47, %v2132_v49 }
 0x8c0   : > { %v2140_v51 = vsel %vm1465_vm6, %v2139_v50, %v2136_v48 }
 0x8c1   : > { %4475 = vmatmul.mubr.msk.f32.vlgmr.msra.gmra.mrb[14].mxu0 %vm708_vm2, %v2140_v51 }
 0x8c2   : > { %4490 = vmatprep.mubr.msk.f32.mxu0 %vm5026_vm3, %v5025_v23  ;;  %4489 = vmatpush3.xpose.msk.msra.mxu0 %vm799_vm4, %v2366_v62 }
 0x8c3   : > { %4498 = vmatprep.subr.mxu0 %v5025_v23 }
 0x994   : > { %v4476_v53 = vpop.f32.mrb[14].mxu0 }
 0x995   : > { %v2230_v54 = vadd.f32 %v4476_v53, %v4211_v52  ;;  %v2224_v55 = vpop.f32.mrb[15].mxu0 }
 0x996   : > { %v2225_v56 = vadd.f32 %v4211_v52, %v2224_v55 }
 0x997   : > { %v2234_v57 = vadd.f32 %v2230_v54, %v5321_v22 }
 0x998   : > { %v2233_v58 = vadd.f32 %v2225_v56, %v5317_v20  ;;  %v2274_v20 = vld [vmem:[%s5773_s6] sm:$0xff] }
 0x999   : > { %v2238_v59 = vsel %vm708_vm2, %v2234_v57, 0.0  ;;  %v4633_v9 = vpack.c.bf16 %v2275_v8, %v2274_v20 }
 0x99a   : > { %2239 = vadd.xlane.f32.xlu1 %v2238_v59  ;;  %v2235_v60 = vsel %vm708_vm2, %v2233_v58, 0.0 }
 0x99b   : > { %2236 = vadd.xlane.f32.xlu0 %v2235_v60  ;;  %4634 = vmatprep.subr.bf16.mxu1 %v4633_v9 }
 0x99c   : > { %4636 = vmatpush3.bf16.msra.mxu1 %v4633_v9 }
 0x99d   : > { %4638 = vmatprep.subr.bf16.mxu1 %v4637_v12 }
 0x9a0   : > { %4640 = vmatpush3.bf16.msra.mxu1 %v4637_v12 }
 0x9a1   : > { %4493 = vmatprep.subr.mxu1 %v5025_v23 }
 0x9ab   : > { %2376 = vrot.lane.b32.xlu1 %v2366_v62, %s5028_s0 }
 0x9af   : > { %2378 = vrot.lane.b32.xlu1 %v2366_v62, %s5030_s19 }
 0x9b3   : > { %2380 = vrot.lane.b32.xlu1 %v2366_v62, %s5027_s28 }
 0xa27   : > { %v2240_v61 = vpop.xlane.xlu1 %2239 }
 0xa28   : > { %v2243_v1 = vmul.f32 0.03125, %v2240_v61  ;;  %v2237_v2 = vpop.xlane.xlu0 %2236 }
 0xa29   : > { %v2242_v26 = vmul.f32 0.03125, %v2237_v2 }
 0xa2a   : > { %v2245_v3 = vsub.f32 %v2234_v57, %v2243_v1 }
 0xa2b   : > { %v2244_v4 = vsub.f32 %v2233_v58, %v2242_v26  ;;  %v2377_v36 = vpop.permute.xlu1 %2376 }
 0xa2c   : > { %v2247_v7 = vmul.f32 %v2245_v3, %v2245_v3 }
 0xa2d   : > { %v2246_v5 = vmul.f32 %v2244_v4, %v2244_v4 }
 0xa2e   : > { %v2251_v22 = vsel %vm708_vm2, %v2247_v7, 0.0 }
 0xa2f   : > { %v2248_v6 = vsel %vm708_vm2, %v2246_v5, 0.0  ;;  %v2379_v42 = vpop.permute.xlu1 %2378 }
 0xa30   : > { %2249 = vadd.xlane.f32.xlu0 %v2248_v6 }
 0xa33   : > { %v2381_v43 = vpop.permute.xlu1 %2380 }
 0xa34   : > { %2252 = vadd.xlane.f32.xlu0 %v2251_v22 }
 0xabd   : > { %v2250_v0 = vpop.xlane.xlu0 %2249 }
 0xabe   : > { %v2254_v13 = vmul.f32 0.03125, %v2250_v0 }
 0xac0   : > { %v2256_v15 = vadd.f32 1e-06, %v2254_v13 }
 0xac1   : > { %v2253_v16 = vpop.xlane.xlu0 %2252 }
 0xac2   : > { %4784 = vrsqrt.f32 %v2256_v15  ;;  %v2255_v63 = vmul.f32 0.03125, %v2253_v16 }
 0xac4   : > { %v2257_v18 = vadd.f32 1e-06, %v2255_v63 }
 0xac6   : > { %4786 = vrsqrt.f32 %v2257_v18 }
 0xacc   : > { %v4785_v27 = vpop.eup %4784 }
 0xacd   : > { %v2260_v28 = vmul.f32 %v4785_v27, %v2244_v4 }
 0xacf   : > { %v2266_v30 = vmul.f32 %v2265_v25, %v2260_v28 }
 0xad0   : > { %v4787_v32 = vpop.eup %4786 }
 0xad1   : > { %v2261_v31 = vmul.f32 %v4787_v32, %v2245_v3  ;;  %v5531_v33 = vadd.f32 %v2271_v29, %v2266_v30 }
 0xad3   : > { %v2267_v34 = vmul.f32 %v2265_v25, %v2261_v31  ;;  %4485 = vmatprep.mubr.msk.f32.mxu1 %vm708_vm2, %v5531_v33 }
 0xad5   : > { %v5535_v35 = vadd.f32 %v2271_v29, %v2267_v34 }
 0xad7   : > { %4486 = vmatmul.mubr.msk.f32.vlgmr.msra.gmra.mrb[20].mxu1 %vm708_vm2, %v5535_v35 }
 0xad8   : > { %4495 = vmatprep.mubr.msk.f32.mxu1 %vm5026_vm3, %v5025_v23  ;;  %4494 = vmatpush3.xpose.msk.msra.mxu1 %vm799_vm4, %v2377_v36 }
 0xad9   : > { %4503 = vmatprep.subr.mxu1 %v5025_v23 }
 0xbaa   : > { %v4487_v38 = vpop.f32.mrb[20].mxu1 }
 0xbab   : > { %v5546_v39 = vadd.f32 %v4487_v38, %v4214_v37  ;;  %v2357_v40 = vpop.f32.mrb[21].mxu1 }
 0xbac   : > { %v2358_v41 = vadd.f32 %v4214_v37, %v2357_v40 }
 0xbae   : > { %2373 = vrot.lane.b32.xlu1 %v2358_v41, %s5027_s28  ;;  %2369 = vrot.lane.b32.xlu0 %v2358_v41, %s5028_s0 }
 0xbaf   : > { %4491 = vmatmul.mubr.msk.f32.vlgmr.msra.gmra.mrb[16].mxu0 %vm799_vm4, %v2358_v41 }
 0xbb0   : > { %4499 = vmatpush3.xpose.msk.msra.mxu0 %vm799_vm4, %v2379_v42  ;;  %4500 = vmatprep.mubr.msk.f32.mxu0 %vm5026_vm3, %v5025_v23 }
 0xbb1   : > { %4508 = vmatprep.subr.mxu0 %v5025_v23 }
 0xbb2   : > { %2371 = vrot.lane.b32.xlu0 %v2358_v41, %s5030_s19  ;;  %2722 = vrot.lane.b32.xlu1 %v2366_v62, %s5029_s20  ;;  %v5582_v62 = vld [vmem:[#allocation3 + $0x8] sm:$0xff] }
 0xc20   : > { %v2370_v44 = vpop.permute.xlu0 %2369  ;;  %v2374_v45 = vpop.permute.xlu1 %2373 }
 0xc21   : > { %4496 = vmatmul.mubr.msk.f32.vlgmr.msra.gmra.mrb[22].mxu1 %vm799_vm4, %v2370_v44 }
 0xc22   : > { %4504 = vmatpush3.xpose.msk.msra.mxu1 %vm799_vm4, %v2381_v43  ;;  %4505 = vmatprep.mubr.msk.f32.mxu1 %vm5026_vm3, %v5025_v23 }
 0xc23   : > { %4513 = vmatprep.subr.mxu1 %v5025_v23 }
 0xc24   : > { %v2372_v46 = vpop.permute.xlu0 %2371  ;;  %v2723_v50 = vpop.permute.xlu1 %2722 }
 0xc25   : > { %4501 = vmatmul.mubr.msk.f32.vlgmr.msra.gmra.mrb[18].mxu0 %vm799_vm4, %v2372_v46  ;;  %4506 = vmatmul.mubr.msk.f32.vlgmr.msra.gmra.mrb[24].mxu1 %vm799_vm4, %v2374_v45 }
 0xc26   : > { %4510 = vmatprep.mubr.msk.f32.mxu0 %vm5026_vm3, %v5025_v23  ;;  %4515 = vmatprep.mubr.msk.f32.mxu1 %vm5026_vm3, %v5025_v23 }
 0xc27   : > { %4509 = vmatpush3.msra.mxu0 %v2723_v50 }
 0xc28   : > { %4518 = vmatprep.subr.mxu0 %v5025_v23 }
 0xc82   : > { %v2452_v47 = vpop.f32.mrb[16].mxu0 }
 0xc83   : > { %v4492_v48 = vpop.f32.mrb[17].mxu0  ;;  %v2678_v49 = vsel %vm799_vm4, %v2452_v47, -inf }
 0xc84   : > { %2679 = vmax.xlane.f32.xlu0 %v2678_v49 }
 0xcf4   : > { %v2526_v51 = vpop.f32.mrb[22].mxu1 }
 0xcf5   : > { %v4497_v52 = vpop.f32.mrb[23].mxu1  ;;  %v2681_v53 = vsel %vm799_vm4, %v2526_v51, -inf }
 0xcf6   : > { %2682 = vmax.xlane.f32.xlu1 %v2681_v53 }
 0xcf8   : > { %v2600_v54 = vpop.f32.mrb[18].mxu0  ;;  %v2674_v55 = vpop.f32.mrb[24].mxu1 }
 0xcf9   : > { %v4502_v56 = vpop.f32.mrb[19].mxu0  ;;  %v4507_v57 = vpop.f32.mrb[25].mxu1  ;;  %v2684_v58 = vsel %vm799_vm4, %v2600_v54, -inf  ;;  %v2687_v59 = vsel %vm799_vm4, %v2674_v55, -inf }
 0xcfa   : > { %2685 = vmax.xlane.f32.xlu0 %v2684_v58 }
 0xcfe   : > { %2688 = vmax.xlane.f32.xlu0 %v2687_v59 }
 0xd07   : > { %2874 = vrot.lane.b32.xlu1 %v2379_v42, %s5029_s20 }
 0xd0b   : > { %2950 = vrot.lane.b32.xlu1 %v2381_v43, %s5029_s20 }
 0xd11   : > { %v2680_v60 = vpop.xlane.xlu0 %2679 }
 0xd12   : > { %v2690_v61 = vsub.f32 %v2452_v47, %v2680_v60 }
 0xd14   : > { %2798 = vrot.lane.b32.xlu0 %v2377_v36, %s5029_s20  ;;  %v2694_v1 = vmul.f32 1.442695, %v2690_v61 }
 0xd16   : > { %4788 = vpow2.f32 %v2694_v1 }
 0xd20   : > { %v4789_v2 = vpop.eup %4788 }
 0xd21   : > { %v2702_v26 = vsel %vm799_vm4, %v4789_v2, 0.0 }
 0xd2f   : > { %2703 = vadd.xlane.f32.xlu1 %v2702_v26 }
 0xd40   : > { %3042 = vrot.lane.b32.xlu1 %v5546_v39, %s5028_s0 }
 0xd83   : > { %v2683_v3 = vpop.xlane.xlu1 %2682 }
 0xd84   : > { %v2691_v4 = vsub.f32 %v2526_v51, %v2683_v3 }
 0xd86   : > { %v2696_v5 = vmul.f32 1.442695, %v2691_v4 }
 0xd87   : > { %v2686_v6 = vpop.xlane.xlu0 %2685  ;;  %v2875_v0 = vpop.permute.xlu1 %2874 }
 0xd88   : > { %4790 = vpow2.f32 %v2696_v5  ;;  %v2692_v7 = vsub.f32 %v2600_v54, %v2686_v6 }
 0xd8a   : > { %v2698_v22 = vmul.f32 1.442695, %v2692_v7 }
 0xd8b   : > { %v2689_v20 = vpop.xlane.xlu0 %2688  ;;  %v2951_v15 = vpop.permute.xlu1 %2950 }
 0xd8c   : > { %4792 = vpow2.f32 %v2698_v22  ;;  %v2693_v13 = vsub.f32 %v2674_v55, %v2689_v20 }
 0xd8e   : > { %v2700_v14 = vmul.f32 1.442695, %v2693_v13 }
 0xd8f   : > { %v2799_v8 = vpop.permute.xlu0 %2798 }
 0xd90   : > { %4514 = vmatpush3.msra.mxu1 %v2799_v8  ;;  %4794 = vpow2.f32 %v2700_v14 }
 0xd91   : > { %4523 = vmatprep.subr.mxu1 %v5025_v23 }
 0xd92   : > { %v4791_v9 = vpop.eup %4790 }
 0xd93   : > { %v2705_v10 = vsel %vm799_vm4, %v4791_v9, 0.0 }
 0xd94   : > { %2706 = vadd.xlane.f32.xlu0 %v2705_v10 }
 0xd96   : > { %v4793_v11 = vpop.eup %4792 }
 0xd97   : > { %v2708_v12 = vsel %vm799_vm4, %v4793_v11, 0.0 }
 0xd98   : > { %2709 = vadd.xlane.f32.xlu1 %v2708_v12 }
 0xd9a   : > { %v4795_v63 = vpop.eup %4794 }
 0xd9b   : > { %v2711_v24 = vsel %vm799_vm4, %v4795_v63, 0.0 }
 0xda9   : > { %3053 = vrot.lane.b32.xlu1 %v5582_v62, %s5027_s28 }
 0xdaa   : > { %3049 = vrot.lane.b32.xlu0 %v5582_v62, %s5028_s0 }
 0xdad   : > { %3046 = vrot.lane.b32.xlu1 %v5546_v39, %s5027_s28 }
 0xdbc   : > { %v2704_v16 = vpop.xlane.xlu1 %2703 }
 0xdbd   : > { %4796 = vrcp.f32 %v2704_v16 }
 0xdc0   : > { %v3043_v25 = vpop.permute.xlu1 %3042 }
 0xdc7   : > { %v4797_v18 = vpop.eup %4796 }
 0xdc8   : > { %v2718_v19 = vmul.f32 %v4797_v18, %v4789_v2 }
 0xdc9   : > { %2712 = vadd.xlane.f32.xlu0 %v2711_v24 }
 0xdca   : > { %4511 = vmatmul.mubr.msk.f32.vlgmr.msra.gmra.mrb[20].mxu0 %vm799_vm4, %v2718_v19 }
 0xdcb   : > { %4519 = vmatpush3.msra.mxu0 %v2875_v0  ;;  %4520 = vmatprep.mubr.msk.f32.mxu0 %vm5026_vm3, %v5025_v23 }
 0xdcc   : > { %4528 = vmatprep.subr.mxu0 %v5025_v23 }
 0xddf   : > { %3051 = vrot.lane.b32.xlu0 %v5582_v62, %s5030_s19 }
 0xde3   : > { %3044 = vrot.lane.b32.xlu0 %v5546_v39, %s5030_s19 }
 0xe21   : > { %v2707_v27 = vpop.xlane.xlu0 %2706 }
 0xe22   : > { %4798 = vrcp.f32 %v2707_v27 }
 0xe25   : > { %v2710_v28 = vpop.xlane.xlu1 %2709  ;;  %v5613_v34 = vpop.permute.xlu0 %3049 }
 0xe26   : > { %4800 = vrcp.f32 %v2710_v28 }
 0xe29   : > { %v5624_v41 = vpop.permute.xlu1 %3053 }
 0xe2c   : > { %v4799_v29 = vpop.eup %4798 }
 0xe2d   : > { %v2719_v30 = vmul.f32 %v4799_v29, %v4791_v9  ;;  %v3047_v42 = vpop.permute.xlu1 %3046 }
 0xe2f   : > { %4516 = vmatmul.mubr.msk.f32.vlgmr.msra.gmra.mrb[26].mxu1 %vm799_vm4, %v2719_v30 }
 0xe30   : > { %v4801_v32 = vpop.eup %4800  ;;  %4524 = vmatpush3.msra.mxu1 %v2951_v15  ;;  %4525 = vmatprep.mubr.msk.f32.mxu1 %vm5026_vm3, %v5025_v23 }
 0xe31   : > { %v2720_v31 = vmul.f32 %v4801_v32, %v4793_v11  ;;  %4533 = vmatprep.subr.mxu1 %v5025_v23 }
 0xe33   : > { %4521 = vmatmul.mubr.msk.f32.vlgmr.msra.gmra.mrb[22].mxu0 %vm799_vm4, %v2720_v31 }
 0xe34   : > { %4529 = vmatpush3.xpose.msk.msra.mxu0 %vm799_vm4, %v5582_v62  ;;  %4530 = vmatprep.mubr.msk.f32.mxu0 %vm5026_vm3, %v5025_v23 }
 0xe35   : > { %4538 = vmatprep.subr.mxu0 %v5025_v23 }
 0xe37   : > { %4531 = vmatmul.mubr.msk.f32.vlgmr.msra.gmra.mrb[24].mxu0 %vm799_vm4, %v5546_v39 }
 0xe38   : > { %4540 = vmatprep.mubr.msk.f32.mxu0 %vm5026_vm3, %v5025_v23 }
 0xe56   : > { %v2713_v36 = vpop.xlane.xlu0 %2712 }
 0xe57   : > { %4802 = vrcp.f32 %v2713_v36 }
 0xe5a   : > { %v5615_v37 = vpop.permute.xlu0 %3051 }
 0xe5b   : > { %4539 = vmatpush3.xpose.msk.msra.mxu0 %vm799_vm4, %v5615_v37 }
 0xe5c   : > { %4548 = vmatprep.subr.mxu0 %v5025_v23 }
 0xe5e   : > { %v3045_v38 = vpop.permute.xlu0 %3044 }
 0xe5f   : > { %4541 = vmatmul.mubr.msk.f32.vlgmr.msra.gmra.mrb[26].mxu0 %vm799_vm4, %v3045_v38 }
 0xe60   : > { %4550 = vmatprep.mubr.msk.f32.mxu0 %vm5026_vm3, %v5025_v23 }
 0xe61   : > { %v4803_v39 = vpop.eup %4802 }
 0xe62   : > { %v2721_v40 = vmul.f32 %v4803_v39, %v4795_v63 }
 0xe64   : > { %4526 = vmatmul.mubr.msk.f32.vlgmr.msra.gmra.mrb[28].mxu1 %vm799_vm4, %v2721_v40 }
 0xe65   : > { %4534 = vmatpush3.xpose.msk.msra.mxu1 %vm799_vm4, %v5613_v34  ;;  %4535 = vmatprep.mubr.msk.f32.mxu1 %vm5026_vm3, %v5025_v23 }
 0xe66   : > { %4543 = vmatprep.subr.mxu1 %v5025_v23 }
 0xe68   : > { %4536 = vmatmul.mubr.msk.f32.vlgmr.msra.gmra.mrb[30].mxu1 %vm799_vm4, %v3043_v25 }
 0xe69   : > { %4544 = vmatpush3.xpose.msk.msra.mxu1 %vm799_vm4, %v5624_v41  ;;  %4545 = vmatprep.mubr.msk.f32.mxu1 %vm5026_vm3, %v5025_v23 }
 0xe6a   : > { %4553 = vmatprep.subr.mxu1 %v5025_v23 }
 0xe6c   : > { %4546 = vmatmul.mubr.msk.f32.vlgmr.msra.gmra.mrb[32].mxu1 %vm799_vm4, %v3047_v42 }
 0xe6d   : > { %4555 = vmatprep.mubr.msk.f32.mxu1 %vm5026_vm3, %v5025_v23 }
 0xe9d   : > { %v5640_v43 = vpop.f32.mrb[20].mxu0 }
 0xe9e   : > { %v4512_v44 = vpop.f32.mrb[21].mxu0 }
 0xf02   : > { %v2870_v45 = vpop.f32.mrb[26].mxu1 }
 0xf03   : > { %v4517_v46 = vpop.f32.mrb[27].mxu1 }
 0xf06   : > { %v2946_v47 = vpop.f32.mrb[22].mxu0 }
 0xf07   : > { %v4522_v48 = vpop.f32.mrb[23].mxu0 }
 0xf08   : > { %v3715_v48 = vld [vmem:[#allocation10 + $0x8] sm:$0xff] }
 0xf0a   : > { %v3125_v49 = vpop.f32.mrb[24].mxu0 }
 0xf0b   : > { %v4532_v50 = vpop.f32.mrb[25].mxu0  ;;  %v3351_v51 = vsel %vm799_vm4, %v3125_v49, -inf }
 0xf0c   : > { %3352 = vmax.xlane.f32.xlu0 %v3351_v51  ;;  %v3716_v51 = vld [vmem:[#allocation10 + $0x10] sm:$0xff] }
 0xf32   : > { %v3273_v52 = vpop.f32.mrb[26].mxu0 }
 0xf33   : > { %v4542_v53 = vpop.f32.mrb[27].mxu0  ;;  %v3357_v54 = vsel %vm799_vm4, %v3273_v52, -inf }
 0xf34   : > { %3358 = vmax.xlane.f32.xlu0 %v3357_v54 }
 0xf37   : > { %v3022_v55 = vpop.f32.mrb[28].mxu1 }
 0xf38   : > { %v4527_v56 = vpop.f32.mrb[29].mxu1 }
 0xf3b   : > { %v3199_v57 = vpop.f32.mrb[30].mxu1 }
 0xf3c   : > { %v4537_v58 = vpop.f32.mrb[31].mxu1  ;;  %v3354_v59 = vsel %vm799_vm4, %v3199_v57, -inf }
 0xf3d   : > { %3355 = vmax.xlane.f32.xlu1 %v3354_v59 }
 0xf3f   : > { %v3347_v60 = vpop.f32.mrb[32].mxu1 }
 0xf40   : > { %v4547_v61 = vpop.f32.mrb[33].mxu1  ;;  %v3360_v1 = vsel %vm799_vm4, %v3347_v60, -inf }
 0xf41   : > { %3361 = vmax.xlane.f32.xlu0 %v3360_v1 }
 0xf4e   : > { %3395 = vrot.lane.b32.xlu1 %v5582_v62, %s5029_s20 }
 0xf99   : > { %v3353_v2 = vpop.xlane.xlu0 %3352 }
 0xf9a   : > { %v3363_v26 = vsub.f32 %v3125_v49, %v3353_v2 }
 0xf9c   : > { %v3367_v3 = vmul.f32 1.442695, %v3363_v26 }
 0xf9e   : > { %4804 = vpow2.f32 %v3367_v3 }
 0xfa8   : > { %v4805_v4 = vpop.eup %4804 }
 0xfa9   : > { %v3375_v5 = vsel %vm799_vm4, %v4805_v4, 0.0 }
 0xfaa   : > { %3376 = vadd.xlane.f32.xlu1 %v3375_v5 }
 0xfc1   : > { %v3359_v6 = vpop.xlane.xlu0 %3358 }
 0xfc2   : > { %v3365_v7 = vsub.f32 %v3273_v52, %v3359_v6  ;;  %v3717_v52 = vld [vmem:[#allocation10 + $0x18] sm:$0xff] }
 0xfc3   : > { %v4645_v53 = vpack.c.bf16 %v3717_v52, %v3716_v51 }
 0xfc4   : > { %v3371_v22 = vmul.f32 1.442695, %v3365_v7 }
 0xfc6   : > { %4806 = vpow2.f32 %v3371_v22 }
 0xfca   : > { %v3356_v20 = vpop.xlane.xlu1 %3355 }
 0xfcb   : > { %v3364_v8 = vsub.f32 %v3199_v57, %v3356_v20 }
 0xfcd   : > { %v3369_v9 = vmul.f32 1.442695, %v3364_v8 }
 0xfce   : > { %v3362_v10 = vpop.xlane.xlu0 %3361  ;;  %v3396_v11 = vpop.permute.xlu1 %3395 }
 0xfcf   : > { %4808 = vpow2.f32 %v3369_v9  ;;  %v3366_v12 = vsub.f32 %v3347_v60, %v3362_v10  ;;  %4549 = vmatpush3.msra.mxu0 %v3396_v11 }
 0xfd0   : > { %v4807_v62 = vpop.eup %4806  ;;  %4558 = vmatprep.subr.mxu0 %v5025_v23 }
 0xfd1   : > { %v3373_v0 = vmul.f32 1.442695, %v3366_v12  ;;  %v3381_v13 = vsel %vm799_vm4, %v4807_v62, 0.0 }
 0xfd2   : > { %3382 = vadd.xlane.f32.xlu1 %v3381_v13 }
 0xfd3   : > { %4810 = vpow2.f32 %v3373_v0 }
 0xfd9   : > { %v4809_v14 = vpop.eup %4808 }
 0xfda   : > { %v3378_v15 = vsel %vm799_vm4, %v4809_v14, 0.0 }
 0xfdb   : > { %3379 = vadd.xlane.f32.xlu0 %v3378_v15 }
 0xfdd   : > { %v4811_v16 = vpop.eup %4810 }
 0xfde   : > { %v3384_v63 = vsel %vm799_vm4, %v4811_v16, 0.0 }
 0xfdf   : > { %3385 = vadd.xlane.f32.xlu0 %v3384_v63  ;;  %v3847_v63 = vld [vmem:[#allocation12 + $0x8] sm:$0xff] }
 0xfe3   : > { %3547 = vrot.lane.b32.xlu1 %v5615_v37, %s5029_s20 }
 0xfe7   : > { %3623 = vrot.lane.b32.xlu1 %v5624_v41, %s5029_s20 }
 0xfeb   : > { %3031 = vrot.lane.b32.xlu1 %v2946_v47, %s5032_s17  ;;  %v3714_v47 = vld [vmem:[#allocation10] sm:$0xff] }
 0xfef   : > { %3035 = vrot.lane.b32.xlu1 %v3022_v55, %s5033_s26 }
 0xff5   : > { %3471 = vrot.lane.b32.xlu0 %v5613_v34, %s5029_s20  ;;  %s5813_s20 = sld [smem:[#allocation21_spill]] }
 0xff9   : > { %3027 = vrot.lane.b32.xlu0 %v2870_v45, %s5034_s30 }
 0xffb   : > { %v4241_v3 = vld [vmem:[%s5813_s20] ss:$0 sm:$0xff] }
0x1037   : > { %v3377_v18 = vpop.xlane.xlu1 %3376 }
0x1038   : > { %4812 = vrcp.f32 %v3377_v18 }
0x1042   : > { %v4813_v19 = vpop.eup %4812 }
0x1043   : > { %v3391_v24 = vmul.f32 %v4813_v19, %v4805_v4  ;;  %v3848_v19 = vld [vmem:[#allocation12 + $0x10] sm:$0xff] }
0x1045   : > { %4551 = vmatmul.mubr.msk.f32.vlgmr.msra.gmra.mrb[28].mxu0 %vm799_vm4, %v3391_v24  ;;  %v3849_v24 = vld [vmem:[#allocation12 + $0x18] sm:$0xff] }
0x1046   : > { %4560 = vmatprep.mubr.msk.f32.mxu0 %vm5026_vm3, %v5025_v23 }
0x105f   : > { %v3383_v25 = vpop.xlane.xlu1 %3382 }
0x1060   : > { %4814 = vrcp.f32 %v3383_v25  ;;  %v4653_v25 = vpack.c.bf16 %v3849_v24, %v3848_v19 }
0x1063   : > { %v3548_v27 = vpop.permute.xlu1 %3547 }
0x1064   : > { %4559 = vmatpush3.msra.mxu0 %v3548_v27 }
0x1067   : > { %v3624_v30 = vpop.permute.xlu1 %3623 }
0x1068   : > { %v3380_v28 = vpop.xlane.xlu0 %3379 }
0x1069   : > { %4816 = vrcp.f32 %v3380_v28 }
0x106a   : > { %v4815_v29 = vpop.eup %4814 }
0x106b   : > { %v3393_v32 = vmul.f32 %v4815_v29, %v4807_v62  ;;  %v3032_v34 = vpop.permute.xlu1 %3031 }
0x106c   : > { %v3386_v31 = vpop.xlane.xlu0 %3385 }
0x106d   : > { %4818 = vrcp.f32 %v3386_v31  ;;  %4561 = vmatmul.mubr.msk.f32.vlgmr.msra.gmra.mrb[30].mxu0 %vm799_vm4, %v3393_v32 }
0x106f   : > { %v3036_v41 = vpop.permute.xlu1 %3035 }
0x1070   : > { %v3472_v36 = vpop.permute.xlu0 %3471 }
0x1071   : > { %4554 = vmatpush3.msra.mxu1 %v3472_v36 }
0x1072   : > { %4563 = vmatprep.subr.mxu1 %v5025_v23 }
0x1073   : > { %v4817_v37 = vpop.eup %4816 }
0x1074   : > { %v3392_v38 = vmul.f32 %v4817_v37, %v4809_v14  ;;  %v3028_v39 = vpop.permute.xlu0 %3027 }
0x1075   : > { %v3038_v40 = vsel %vm799_vm4, %v5640_v43, %v3028_v39  ;;  %v4641_v43 = vpack.c.bf16 %v3715_v48, %v3714_v47 }
0x1076   : > { %v3039_v42 = vsel %vm1463_vm5, %v3038_v40, %v3032_v34  ;;  %4556 = vmatmul.mubr.msk.f32.vlgmr.msra.gmra.mrb[34].mxu1 %vm799_vm4, %v3392_v38 }
0x1077   : > { %v4819_v44 = vpop.eup %4818  ;;  %4564 = vmatpush3.msra.mxu1 %v3624_v30  ;;  %v3040_v45 = vsel %vm1465_vm6, %v3039_v42, %v3036_v41  ;;  %4565 = vmatprep.mubr.msk.f32.mxu1 %vm5026_vm3, %v5025_v23 }
0x1078   : > { %v3394_v46 = vmul.f32 %v4819_v44, %v4811_v16  ;;  %4576 = vmatprep.mubr.msk.f32.mxu0 %vm708_vm2, %v3040_v45  ;;  %4642 = vmatprep.subr.bf16.mxu0 %v4641_v43  ;;  %v3836_v45 = vsub.s32 2, %v5520_v17 }
0x1079   : > { %4644 = vmatpush3.bf16.msra.mxu0 %v4641_v43 }
0x107a   : > { %4566 = vmatmul.mubr.msk.f32.vlgmr.msra.gmra.mrb[36].mxu1 %vm799_vm4, %v3394_v46  ;;  %4646 = vmatprep.subr.bf16.mxu0 %v4645_v53  ;;  %v3842_v46 = vsub.s32 3, %v5520_v17  ;;  %v3837_v47 = vrot.slane %v5526_v21, %v3836_v45 }
0x107d   : > { %4648 = vmatpush3.bf16.msra.mxu0 %v4645_v53 }
0x1118   : > { %v3467_v49 = vpop.f32.mrb[28].mxu0 }
0x1119   : > { %v4552_v50 = vpop.f32.mrb[29].mxu0 }
0x1140   : > { %v3619_v54 = vpop.f32.mrb[30].mxu0 }
0x1141   : > { %v4562_v55 = vpop.f32.mrb[31].mxu0 }
0x1149   : > { %v3543_v23 = vpop.f32.mrb[34].mxu1 }
0x114a   : > { %3700 = vrot.lane.b32.xlu0 %v3543_v23, %s5034_s30  ;;  %v4557_v56 = vpop.f32.mrb[35].mxu1 }
0x114d   : > { %v3695_v57 = vpop.f32.mrb[36].mxu1 }
0x114e   : > { %3708 = vrot.lane.b32.xlu1 %v3695_v57, %s5033_s26  ;;  %v4567_v58 = vpop.f32.mrb[37].mxu1  ;;  %3704 = vrot.lane.b32.xlu0 %v3619_v54, %s5032_s17  ;;  %s5814_s26 = sld [smem:[#allocation23_spill]] }
0x114f   : > { %v4244_v58 = vld [vmem:[%s5815_s15] ss:$0 sm:$0xff] }
0x1154   : > { %v3940_v27 = vld [vmem:[%s5814_s26] sm:$0xff]  ;;  %v3941_v28 = vld [vmem:[%s5814_s26 + $0x8] sm:$0xff]  ;;  %v3942_v29 = vld [vmem:[%s5814_s26 + $0x10] sm:$0xff] }
0x1155   : > { %v4657_v30 = vpack.c.bf16 %v3941_v28, %v3940_v27  ;;  %v3943_v32 = vld [vmem:[%s5814_s26 + $0x18] sm:$0xff]  ;;  %v3944_v34 = vld [vmem:[%s5814_s26 + $0x20] sm:$0xff]  ;;  %v3945_v36 = vld [vmem:[%s5814_s26 + $0x28] sm:$0xff]  ;;  %v4067_v27 = vsub.s32 4, %v5520_v17  ;;  %v4073_v28 = vsub.s32 5, %v5520_v17 }
0x1156   : > { %v4661_v31 = vpack.c.bf16 %v3943_v32, %v3942_v29  ;;  %v4665_v37 = vpack.c.bf16 %v3945_v36, %v3944_v34  ;;  %v3946_v23 = vld [vmem:[%s5814_s26 + $0x30] sm:$0xff]  ;;  %v3947_v56 = vld [vmem:[%s5814_s26 + $0x38] sm:$0xff] }
0x1157   : > { %4658 = vmatprep.subr.bf16.mxu0 %v4657_v30  ;;  %v4669_v57 = vpack.c.bf16 %v3947_v56, %v3946_v23  ;;  %v4068_v29 = vrot.slane %v5526_v21, %v4067_v27  ;;  %v4074_v34 = vrot.slane %v5526_v21, %v4073_v28 }
0x11bc   : > { %v3701_v59 = vpop.permute.xlu0 %3700 }
0x11bd   : > { %v3711_v60 = vsel %vm799_vm4, %v3467_v49, %v3701_v59  ;;  %v3843_v49 = vrot.slane %v5526_v21, %v3842_v46 }
0x11c0   : > { %v3709_v61 = vpop.permute.xlu1 %3708  ;;  %v3705_v1 = vpop.permute.xlu0 %3704 }
0x11c1   : > { %v3712_v2 = vsel %vm1463_vm5, %v3711_v60, %v3705_v1 }
0x11c2   : > { %v3713_v26 = vsel %vm1465_vm6, %v3712_v2, %v3709_v61 }
0x11c3   : > { %4577 = vmatmul.mubr.msk.f32.vlgmr.msra.gmra.mrb[32].mxu0 %vm708_vm2, %v3713_v26 }
0x11c4   : > { %4660 = vmatpush3.bf16.msra.mxu0 %v4657_v30 }
0x11c5   : > { %4662 = vmatprep.subr.bf16.mxu0 %v4661_v31 }
0x11c8   : > { %4664 = vmatpush3.bf16.msra.mxu0 %v4661_v31 }
0x11c9   : > { %4666 = vmatprep.subr.bf16.mxu0 %v4665_v37 }
0x11cc   : > { %4668 = vmatpush3.bf16.msra.mxu0 %v4665_v37 }
0x11cd   : > { %4670 = vmatprep.subr.bf16.mxu0 %v4669_v57 }
0x11d0   : > { %4672 = vmatpush3.bf16.msra.mxu0 %v4669_v57 }
0x1296   : > { %v4578_v4 = vpop.f32.mrb[32].mxu0 }
0x1297   : > { %v3803_v5 = vadd.f32 %v4578_v4, %v4241_v3  ;;  %v3797_v6 = vpop.f32.mrb[33].mxu0 }
0x1298   : > { %v3798_v7 = vadd.f32 %v4241_v3, %v3797_v6  ;;  %v4247_v3 = vld [vmem:[%s5816_s18] ss:$0 sm:$0xff] }
0x1299   : > { %v3807_v22 = vadd.f32 %v3803_v5, %v5535_v35 }
0x129a   : > { %v3806_v20 = vadd.f32 %v3798_v7, %v5531_v33  ;;  %v3846_v33 = vld [vmem:[#allocation12] sm:$0xff] }
0x129b   : > { %v3811_v8 = vsel %vm708_vm2, %v3807_v22, 0.0  ;;  %v4649_v18 = vpack.c.bf16 %v3847_v63, %v3846_v33 }
0x129c   : > { %3812 = vadd.xlane.f32.xlu1 %v3811_v8  ;;  %v3808_v9 = vsel %vm708_vm2, %v3806_v20, 0.0 }
0x129d   : > { %3809 = vadd.xlane.f32.xlu0 %v3808_v9  ;;  %4650 = vmatprep.subr.bf16.mxu1 %v4649_v18 }
0x129e   : > { %4652 = vmatpush3.bf16.msra.mxu1 %v4649_v18 }
0x129f   : > { %4654 = vmatprep.subr.bf16.mxu1 %v4653_v25 }
0x12a2   : > { %4656 = vmatpush3.bf16.msra.mxu1 %v4653_v25 }
0x1329   : > { %v3813_v10 = vpop.xlane.xlu1 %3812 }
0x132a   : > { %v3815_v11 = vmul.f32 0.03125, %v3813_v10  ;;  %v3810_v12 = vpop.xlane.xlu0 %3809 }
0x132b   : > { %v3814_v62 = vmul.f32 0.03125, %v3810_v12 }
0x132c   : > { %v3817_v0 = vsub.f32 %v3807_v22, %v3815_v11 }
0x132d   : > { %v3816_v13 = vsub.f32 %v3806_v20, %v3814_v62 }
0x132e   : > { %v3819_v16 = vmul.f32 %v3817_v0, %v3817_v0 }
0x132f   : > { %v3818_v14 = vmul.f32 %v3816_v13, %v3816_v13 }
0x1330   : > { %v3823_v35 = vsel %vm708_vm2, %v3819_v16, 0.0 }
0x1331   : > { %v3820_v15 = vsel %vm708_vm2, %v3818_v14, 0.0 }
0x1332   : > { %3821 = vadd.xlane.f32.xlu0 %v3820_v15 }
0x1336   : > { %3824 = vadd.xlane.f32.xlu0 %v3823_v35 }
0x13bf   : > { %v3822_v38 = vpop.xlane.xlu0 %3821 }
0x13c0   : > { %v3826_v39 = vmul.f32 0.03125, %v3822_v38 }
0x13c2   : > { %v3828_v40 = vadd.f32 1e-05, %v3826_v39 }
0x13c3   : > { %v3825_v41 = vpop.xlane.xlu0 %3824 }
0x13c4   : > { %4820 = vrsqrt.f32 %v3828_v40  ;;  %v3827_v42 = vmul.f32 0.03125, %v3825_v41 }
0x13c6   : > { %v3829_v44 = vadd.f32 1e-05, %v3827_v42 }
0x13c8   : > { %4822 = vrsqrt.f32 %v3829_v44 }
0x13ce   : > { %v4821_v48 = vpop.eup %4820 }
0x13cf   : > { %v3832_v43 = vmul.f32 %v4821_v48, %v3816_v13 }
0x13d1   : > { %v3838_v50 = vmul.f32 %v3837_v47, %v3832_v43 }
0x13d2   : > { %v4823_v51 = vpop.eup %4822 }
0x13d3   : > { %v3833_v52 = vmul.f32 %v4823_v51, %v3817_v0  ;;  %v3844_v53 = vadd.f32 %v3843_v49, %v3838_v50 }
0x13d5   : > { %v3839_v54 = vmul.f32 %v3837_v47, %v3833_v52  ;;  %4587 = vmatprep.mubr.msk.f32.mxu1 %vm708_vm2, %v3844_v53 }
0x13d7   : > { %v3845_v55 = vadd.f32 %v3843_v49, %v3839_v54 }
0x13d9   : > { %4588 = vmatmul.mubr.msk.f32.vlgmr.msra.gmra.mrb[38].mxu1 %vm708_vm2, %v3845_v55 }
0x14ac   : > { %v4589_v59 = vpop.f32.mrb[38].mxu1 }
0x14ad   : > { %v3935_v60 = vadd.f32 %v4589_v59, %v4244_v58  ;;  %v3929_v61 = vpop.f32.mrb[39].mxu1 }
0x14ae   : > { %v3930_v1 = vadd.f32 %v4244_v58, %v3929_v61 }
0x14af   : > { %v3939_v26 = vmax.f32 %v3935_v60, 0.0 }
0x14b0   : > { %v3938_v2 = vmax.f32 %v3930_v1, 0.0 }
0x14b2   : > { %4606 = vmatprep.mubr.msk.f32.mxu0 %vm3955_vm7, %v3938_v2 }
0x14b3   : > { %4607 = vmatmul.mubr.msk.f32.vlgmr.msra.gmra.mrb[34].mxu0 %vm3955_vm7, %v3939_v26 }
0x1586   : > { %v4608_v4 = vpop.f32.mrb[34].mxu0 }
0x1587   : > { %v4034_v5 = vadd.f32 %v4608_v4, %v4247_v3  ;;  %v4028_v6 = vpop.f32.mrb[35].mxu0 }
0x1588   : > { %v4029_v7 = vadd.f32 %v4247_v3, %v4028_v6 }
0x1589   : > { %v4038_v22 = vadd.f32 %v4034_v5, %v3845_v55 }
0x158a   : > { %v4037_v20 = vadd.f32 %v4029_v7, %v3844_v53 }
0x158b   : > { %v4042_v8 = vsel %vm708_vm2, %v4038_v22, 0.0 }
0x158c   : > { %4043 = vadd.xlane.f32.xlu0 %v4042_v8  ;;  %v4039_v9 = vsel %vm708_vm2, %v4037_v20, 0.0 }
0x158d   : > { %4040 = vadd.xlane.f32.xlu1 %v4039_v9 }
0x1619   : > { %v4044_v10 = vpop.xlane.xlu0 %4043 }
0x161a   : > { %v4046_v11 = vmul.f32 0.03125, %v4044_v10  ;;  %v4041_v12 = vpop.xlane.xlu1 %4040 }
0x161b   : > { %v4045_v62 = vmul.f32 0.03125, %v4041_v12 }
0x161c   : > { %v4048_v0 = vsub.f32 %v4038_v22, %v4046_v11 }
0x161d   : > { %v4047_v13 = vsub.f32 %v4037_v20, %v4045_v62 }
0x161e   : > { %v4050_v14 = vmul.f32 %v4048_v0, %v4048_v0 }
0x161f   : > { %v4049_v15 = vmul.f32 %v4047_v13, %v4047_v13 }
0x1620   : > { %v4054_v16 = vsel %vm708_vm2, %v4050_v14, 0.0 }
0x1621   : > { %4055 = vadd.xlane.f32.xlu0 %v4054_v16  ;;  %v4051_v35 = vsel %vm708_vm2, %v4049_v15, 0.0 }
0x1622   : > { %4052 = vadd.xlane.f32.xlu1 %v4051_v35 }
0x16ae   : > { %v4056_v33 = vpop.xlane.xlu0 %4055 }
0x16af   : > { %v4058_v63 = vmul.f32 0.03125, %v4056_v33  ;;  %v4053_v18 = vpop.xlane.xlu1 %4052 }
0x16b0   : > { %v4057_v19 = vmul.f32 0.03125, %v4053_v18 }
0x16b1   : > { %v4060_v24 = vadd.f32 1e-06, %v4058_v63 }
0x16b2   : > { %v4059_v25 = vadd.f32 1e-06, %v4057_v19 }
0x16b3   : > { %4824 = vrsqrt.f32 %v4060_v24 }
0x16b4   : > { %4826 = vrsqrt.f32 %v4059_v25 }
0x16bd   : > { %v4825_v30 = vpop.eup %4824 }
0x16be   : > { %v4827_v32 = vpop.eup %4826  ;;  %v4064_v31 = vmul.f32 %v4825_v30, %v4048_v0 }
0x16bf   : > { %v4063_v36 = vmul.f32 %v4827_v32, %v4047_v13 }
0x16c0   : > { %v4070_v37 = vmul.f32 %v4068_v29, %v4064_v31 }
0x16c1   : > { %v4069_v38 = vmul.f32 %v4068_v29, %v4063_v36 }
0x16c2   : > { %v4076_v39 = vadd.f32 %v4074_v34, %v4070_v37 }
0x16c3   : > { %v4075_v40 = vadd.f32 %v4074_v34, %v4069_v38 }
0x16c4   : > { %4078 = vst.msk [vmem:[#allocation2 + $0x8] sm:$0xff] %vm708_vm2, %v4076_v39  ;;  %4080 = vst.msk [vmem:[#allocation13 + $0x8] sm:$0xff] %vm708_vm2, %v4076_v39 }
0x16c5   : > { %4077 = vst.msk [vmem:[#allocation2] sm:$0xff] %vm708_vm2, %v4075_v40  ;;  %4079 = vst.msk [vmem:[#allocation13] sm:$0xff] %vm708_vm2, %v4075_v40 }
0x16c6   : > { %4981 = shalt.err (!%p4978_p8)
}
0x16c7   : > { %s5817_s28 = sld [smem:[#allocation25_spill]] }
0x16cd   : > { %s4982_s0 = scalar_lea.hbm %s5817_s28, 256 }
0x16ce   : > { %p4983_p4 = scmp.ne.s32.totalorder %s5817_s28, %s4982_s0  ;;  %p4988_p1 = scmp.lt.u32.totalorder %s4982_s0, %s5817_s28 }
0x16d0   : > { %p4984_p13 = pnand %p4983_p4, %p4723_p7 }
0x16d2   : > { %p4985_p0 = pneg %p4984_p13 }
0x16d4   : > { %p4990_p6 = pnand %p4988_p1, %p4985_p0 }
0x16d6   : > { %4993 = shalt.err (!%p4990_p6)
}
0x16d7   : > { %s5036_s15 = smov 128  }
0x16d8   : > { %4694 = dma.vmem_to_hbm [thread:$0]  (%p4723_p7), %s4088_s24, 256, %s5817_s28, [#allocation6], %s5036_s15, %s5036_s15, %s5034_s30  }
0x16d9   : > { %5011 = dma.done.wait (%p4723_p7), [#allocation6], 256  }
0x16da   : > { %5013 = vsyncadd (%p4723_p7), [#allocation6], 4294967040 }
0x16db PF: > { %s5818_s18 = sld [smem:[#allocation18_spill]] }
0x16e1   : > { %s31_s24 = sadd.s32 1, %s5818_s18  }
0x16e2   : > { %p28_p5 = scmp.ge.s32.totalorder %s31_s24, 4  }
0x16e4   :  { %30 = sbr.rel (!%p28_p5) target bundleno = 12 (0xc), region = 137 }
0x16eb   :  { %4103 = vsyncpa [#allocation5], 1 }
0x16ec   :  { %4105 = vsyncpa [#allocation5 + $0x1], 1 }
0x16ed   :  { %4106 = vsyncpa [#allocation8], 1 }
0x16ee   :  { %4107 = vsyncpa [#allocation11], 1 }
0x16ef   :  { %4108 = vsyncpa [#allocation6], 1 }
0x16f0   :  { %4110 = vsyncpa [#allocation6 + $0x1], 1 }

</bundles_post_ra>
